<compile_context>
chip_gen: v7x
topology: tpu7x:2x2x1
jax: 0.10.0
libtpu: 0.0.40
codegen_flags: <defaults>
</compile_context>

<pallas_src>
import functools
import math

import jax
import jax.numpy as jnp
from jax.experimental import pallas as pl
from jax.experimental.pallas import tpu as pltpu


def _round_up(x, m):
    return (x + m - 1) // m * m


# ----------------------------------------------------------------------------
# TSM temporal shift (stays in JAX; slice+concat form per the review).
# ----------------------------------------------------------------------------
def tsm_shift(x, fold_div=3):
    """Exact reproduction of the PyTorch TSM module (n_frame is forced to 4).

    torch's `input.view(-1, 4, H, W, C)` on a *contiguous NCHW* tensor is a raw
    row-major reshape, so the view's "channel" axis is flat-index % C, not the
    real channel axis.  We reproduce it with a reshape to (G, 4, H*W, C).
    """
    n_frame = 4
    B, C, H, W = x.shape
    assert B % n_frame == 0, "TSM requires B % 4 == 0 (torch .view would fail)"
    fold = C // fold_div
    xv = x.reshape(B // n_frame, n_frame, H * W, C)
    out1 = xv[..., :fold]
    out2 = xv[..., fold:2 * fold]
    out3 = xv[..., 2 * fold:]
    out1 = jnp.concatenate([out1[:, 1:], jnp.zeros_like(out1[:, :1])], axis=1)
    out2 = jnp.concatenate([jnp.zeros_like(out2[:, :1]), out2[:, :-1]], axis=1)
    out = jnp.concatenate([out1, out2, out3], axis=-1)
    return out.reshape(B, C, H, W)


# ----------------------------------------------------------------------------
# Conv2d: in-kernel window gather from the flat padded activation.
# ----------------------------------------------------------------------------
def _make_conv_kernel(Bb, offsets, Lout):
    def kernel(x_ref, w_ref, b_ref, o_ref):
        # x_ref: (Bb, Cin, L)        bf16, flat zero-padded activation
        # w_ref: (KH*KW, Cout, Cin)  bf16, per-tap weights
        # b_ref: (Cout, 1)           f32
        # o_ref: (Bb, Cout, Lout)    f32, lane-dense (Lout % 128 == 0)
        bias = b_ref[...]
        for bi in range(Bb):                       # small static unroll
            acc = None
            for t, off in enumerate(offsets):      # KH*KW taps, static offsets
                part = jnp.dot(w_ref[t], x_ref[bi, :, off:off + Lout],
                               preferred_element_type=jnp.float32)
                acc = part if acc is None else acc + part
            o_ref[bi] = (acc + bias).astype(o_ref.dtype)
    return kernel


def _pick_batch_block(B, bytes_per_batch, target_bytes=2 << 20):
    """Largest divisor of B that keeps >= 2 grid steps (v7x megacore) and keeps
    per-step blocks near `target_bytes` (amortizes the ~0.35us/step cost
    without blowing the per-generation VMEM budgets)."""
    cap = max(1, min(B // 2, int(target_bytes // max(bytes_per_batch, 1))))
    bb = 1
    for d in range(1, cap + 1):
        if B % d == 0:
            bb = d
    return bb


def conv2d_pallas(x_nchw, weight, bias, padding):
    B, Cin, H, W = x_nchw.shape
    Cout, Cin_w, KH, KW = weight.shape
    assert Cin == Cin_w
    p = padding
    Hp, Wp = H + 2 * p, W + 2 * p
    Ho, Wo = Hp - KH + 1, Wp - KW + 1
    out_dtype = x_nchw.dtype

    # Lane-dense output width (multiple of 128 -> unmasked stores).
    Lout = _round_up(Ho * Wp, 128)
    # Flat padded-activation length must cover the largest tap offset + Lout.
    L = _round_up((KH - 1) * Wp + (KW - 1) + Lout, 128)

    # Pad / flatten / bf16-cast the activation (XLA fuses this with tsm_shift).
    x_pad = jnp.pad(x_nchw, ((0, 0), (0, 0), (p, p), (p, p)))
    x_flat = x_pad.reshape(B, Cin, Hp * Wp)
    x_flat = jnp.pad(x_flat, ((0, 0), (0, 0), (0, L - Hp * Wp)))
    x_flat = x_flat.astype(jnp.bfloat16)

    # Per-tap weights (KH*KW, Cout, Cin); ordering matches `offsets` below.
    w_taps = jnp.transpose(weight, (2, 3, 0, 1)).reshape(KH * KW, Cout, Cin)
    w_taps = w_taps.astype(jnp.bfloat16)
    b_col = bias.reshape(Cout, 1).astype(jnp.float32)

    offsets = [ky * Wp + kx for ky in range(KH) for kx in range(KW)]

    bytes_per_batch = Cin * L * 2 + Cout * Lout * 4
    Bb = _pick_batch_block(B, bytes_per_batch)
    grid = (B // Bb,)

    out_flat = pl.pallas_call(
        _make_conv_kernel(Bb, offsets, Lout),
        out_shape=jax.ShapeDtypeStruct((B, Cout, Lout), out_dtype),
        grid=grid,
        in_specs=[
            pl.BlockSpec((Bb, Cin, L), lambda g: (g, 0, 0)),
            pl.BlockSpec((KH * KW, Cout, Cin), lambda g: (0, 0, 0)),
            pl.BlockSpec((Cout, 1), lambda g: (0, 0)),
        ],
        out_specs=pl.BlockSpec((Bb, Cout, Lout), lambda g: (g, 0, 0)),
        compiler_params=pltpu.CompilerParams(
            dimension_semantics=("parallel",),
            vmem_limit_bytes=32 * 1024 * 1024),
    )(x_flat, w_taps, b_col)

    # Crop: flat column j = oh*Wp + ow; keep ow < Wo (extra columns only ever
    # saw the zero padding).  Output is already NCHW -- no transpose.
    out = out_flat[:, :, :Ho * Wp].reshape(B, Cout, Ho, Wp)[:, :, :, :Wo]
    return out


# ----------------------------------------------------------------------------
# TSM_Block forward
# ----------------------------------------------------------------------------
def tsm_block_forward(x, weight, bias, padding, n_frame=2, fold_div=3):
    # The TSM module ignores the n_frame argument (forces 4), matching torch.
    t = tsm_shift(x, fold_div=fold_div)
    return conv2d_pallas(t, weight, bias, padding)


# ----------------------------------------------------------------------------
# Pure-JAX reference (correctness check)
# ----------------------------------------------------------------------------
def _ref_tsm(x, fold_div=3):
    n_frame = 4
    B, C, H, W = x.shape
    xv = x.reshape(-1, n_frame, H, W, C)
    fold = C // fold_div
    out1 = xv[..., :fold]
    out2 = xv[..., fold:2 * fold]
    out3 = xv[..., 2 * fold:]
    out1 = jnp.concatenate([out1[:, 1:], jnp.zeros_like(out1[:, :1])], axis=1)
    out2 = jnp.concatenate([jnp.zeros_like(out2[:, :1]), out2[:, :-1]], axis=1)
    out = jnp.concatenate([out1, out2, out3], axis=-1)
    return out.reshape(B, C, H, W)


def _ref_conv(x, w, b, padding):
    y = jax.lax.conv_general_dilated(
        x, w, window_strides=(1, 1),
        padding=[(padding, padding), (padding, padding)],
        dimension_numbers=("NCHW", "OIHW", "NCHW"))
    return y + b[None, :, None, None]


# ----------------------------------------------------------------------------
if __name__ == "__main__":
    # Small shapes consistent with the module: B must be a multiple of 4.
    B, C, H, W = 8, 4, 16, 16
    in_channels, out_channels, kernel_size, padding = C, 8, 3, 1

    key = jax.random.PRNGKey(0)
    k_x, k_w, k_b = jax.random.split(key, 3)
    x = jax.random.normal(k_x, (B, C, H, W), jnp.float32)

    # Deterministic Conv2d-style init (kaiming-uniform-like bounds).
    bound = 1.0 / math.sqrt(in_channels * kernel_size * kernel_size)
    weight = jax.random.uniform(
        k_w, (out_channels, in_channels, kernel_size, kernel_size),
        jnp.float32, minval=-bound, maxval=bound)
    bias = jax.random.uniform(
        k_b, (out_channels,), jnp.float32, minval=-bound, maxval=bound)

    fwd = jax.jit(functools.partial(tsm_block_forward, padding=padding))
    out = jax.block_until_ready(fwd(x, weight, bias))

    t_ref = _ref_tsm(x)
    ref_f32 = _ref_conv(t_ref, weight, bias, padding)
    # Reference from bf16-rounded operands (same quantization as the kernel,
    # f32 accumulation) -- only accumulation-order noise should remain.
    ref_q = _ref_conv(t_ref.astype(jnp.bfloat16).astype(jnp.float32),
                      weight.astype(jnp.bfloat16).astype(jnp.float32),
                      bias, padding)

    assert out.shape == ref_f32.shape == (B, out_channels, H, W)
    err_q = float(jnp.max(jnp.abs(out - ref_q)))
    err_f = float(jnp.max(jnp.abs(out - ref_f32)))
    assert err_q < 1e-3, f"mismatch vs bf16-operand reference: {err_q}"
    assert err_f < 5e-2, f"mismatch vs f32 reference: {err_f}"

    print("KERNEL_OK")
</pallas_src>

<mosaic_0001>
module attributes {stable_mosaic.version = 11 : i64} {
  func.func @kernel(%arg0: i32, %arg1: memref<4x4x512xbf16, #tpu.memory_space<vmem>>, %arg2: memref<9x8x4xbf16, #tpu.memory_space<vmem>>, %arg3: memref<8x1xf32, #tpu.memory_space<vmem>>, %arg4: memref<4x8x384xf32, #tpu.memory_space<vmem>>) attributes {dimension_semantics = [#tpu.dimension_semantics<parallel>], iteration_bounds = array<i64: 2>, scalar_prefetch = 0 : i64, scratch_operands = 0 : i64, tpu.core_type = #tpu.core_type<tc>, window_params = [{transform_indices = @transform_0, window_bounds = array<i64: 4, 4, 512>}, {pipeline_mode = #tpu.pipeline_mode<synchronous>, transform_indices = @transform_1, window_bounds = array<i64: 9, 8, 4>}, {pipeline_mode = #tpu.pipeline_mode<synchronous>, transform_indices = @transform_2, window_bounds = array<i64: 8, 1>}, {transform_indices = @transform_3, window_bounds = array<i64: 4, 8, 384>}]} {
    %c0 = arith.constant 0 : index
    %c0_0 = arith.constant 0 : index
    %0 = vector.load %arg3[%c0, %c0_0] : memref<8x1xf32, #tpu.memory_space<vmem>>, vector<8x1xf32>
    %c0_1 = arith.constant 0 : index
    %c0_2 = arith.constant 0 : index
    %c0_3 = arith.constant 0 : index
    %1 = vector.load %arg2[%c0_1, %c0_2, %c0_3] : memref<9x8x4xbf16, #tpu.memory_space<vmem>>, vector<1x8x4xbf16>
    %2 = vector.shape_cast %1 : vector<1x8x4xbf16> to vector<8x4xbf16>
    %c0_4 = arith.constant 0 : index
    %c0_5 = arith.constant 0 : index
    %c0_6 = arith.constant 0 : index
    %3 = vector.load %arg1[%c0_4, %c0_5, %c0_6] : memref<4x4x512xbf16, #tpu.memory_space<vmem>>, vector<1x4x384xbf16>
    %4 = vector.shape_cast %3 : vector<1x4x384xbf16> to vector<4x384xbf16>
    %cst = arith.constant dense<0.000000e+00> : vector<8x384xf32>
    %5 = tpu.matmul %2, %4, %cst {dimension_numbers = #tpu.dot_dimension_numbers<[1], [0], [0], [1], [0, 0, 1, 1], [], []>} : vector<8x4xbf16>, vector<4x384xbf16>, vector<8x384xf32> -> vector<8x384xf32>
    %c1 = arith.constant 1 : index
    %c0_7 = arith.constant 0 : index
    %c0_8 = arith.constant 0 : index
    %6 = vector.load %arg2[%c1, %c0_7, %c0_8] : memref<9x8x4xbf16, #tpu.memory_space<vmem>>, vector<1x8x4xbf16>
    %7 = vector.shape_cast %6 : vector<1x8x4xbf16> to vector<8x4xbf16>
    %c0_9 = arith.constant 0 : index
    %c0_10 = arith.constant 0 : index
    %c1_11 = arith.constant 1 : index
    %8 = vector.load %arg1[%c0_9, %c0_10, %c1_11] : memref<4x4x512xbf16, #tpu.memory_space<vmem>>, vector<1x4x384xbf16>
    %9 = vector.shape_cast %8 : vector<1x4x384xbf16> to vector<4x384xbf16>
    %cst_12 = arith.constant dense<0.000000e+00> : vector<8x384xf32>
    %10 = tpu.matmul %7, %9, %cst_12 {dimension_numbers = #tpu.dot_dimension_numbers<[1], [0], [0], [1], [0, 0, 1, 1], [], []>} : vector<8x4xbf16>, vector<4x384xbf16>, vector<8x384xf32> -> vector<8x384xf32>
    %11 = arith.addf %5, %10 : vector<8x384xf32>
    %c2 = arith.constant 2 : index
    %c0_13 = arith.constant 0 : index
    %c0_14 = arith.constant 0 : index
    %12 = vector.load %arg2[%c2, %c0_13, %c0_14] : memref<9x8x4xbf16, #tpu.memory_space<vmem>>, vector<1x8x4xbf16>
    %13 = vector.shape_cast %12 : vector<1x8x4xbf16> to vector<8x4xbf16>
    %c0_15 = arith.constant 0 : index
    %c0_16 = arith.constant 0 : index
    %c2_17 = arith.constant 2 : index
    %14 = vector.load %arg1[%c0_15, %c0_16, %c2_17] : memref<4x4x512xbf16, #tpu.memory_space<vmem>>, vector<1x4x384xbf16>
    %15 = vector.shape_cast %14 : vector<1x4x384xbf16> to vector<4x384xbf16>
    %cst_18 = arith.constant dense<0.000000e+00> : vector<8x384xf32>
    %16 = tpu.matmul %13, %15, %cst_18 {dimension_numbers = #tpu.dot_dimension_numbers<[1], [0], [0], [1], [0, 0, 1, 1], [], []>} : vector<8x4xbf16>, vector<4x384xbf16>, vector<8x384xf32> -> vector<8x384xf32>
    %17 = arith.addf %11, %16 : vector<8x384xf32>
    %c3 = arith.constant 3 : index
    %c0_19 = arith.constant 0 : index
    %c0_20 = arith.constant 0 : index
    %18 = vector.load %arg2[%c3, %c0_19, %c0_20] : memref<9x8x4xbf16, #tpu.memory_space<vmem>>, vector<1x8x4xbf16>
    %19 = vector.shape_cast %18 : vector<1x8x4xbf16> to vector<8x4xbf16>
    %c0_21 = arith.constant 0 : index
    %c0_22 = arith.constant 0 : index
    %c18 = arith.constant 18 : index
    %20 = vector.load %arg1[%c0_21, %c0_22, %c18] : memref<4x4x512xbf16, #tpu.memory_space<vmem>>, vector<1x4x384xbf16>
    %21 = vector.shape_cast %20 : vector<1x4x384xbf16> to vector<4x384xbf16>
    %cst_23 = arith.constant dense<0.000000e+00> : vector<8x384xf32>
    %22 = tpu.matmul %19, %21, %cst_23 {dimension_numbers = #tpu.dot_dimension_numbers<[1], [0], [0], [1], [0, 0, 1, 1], [], []>} : vector<8x4xbf16>, vector<4x384xbf16>, vector<8x384xf32> -> vector<8x384xf32>
    %23 = arith.addf %17, %22 : vector<8x384xf32>
    %c4 = arith.constant 4 : index
    %c0_24 = arith.constant 0 : index
    %c0_25 = arith.constant 0 : index
    %24 = vector.load %arg2[%c4, %c0_24, %c0_25] : memref<9x8x4xbf16, #tpu.memory_space<vmem>>, vector<1x8x4xbf16>
    %25 = vector.shape_cast %24 : vector<1x8x4xbf16> to vector<8x4xbf16>
    %c0_26 = arith.constant 0 : index
    %c0_27 = arith.constant 0 : index
    %c19 = arith.constant 19 : index
    %26 = vector.load %arg1[%c0_26, %c0_27, %c19] : memref<4x4x512xbf16, #tpu.memory_space<vmem>>, vector<1x4x384xbf16>
    %27 = vector.shape_cast %26 : vector<1x4x384xbf16> to vector<4x384xbf16>
    %cst_28 = arith.constant dense<0.000000e+00> : vector<8x384xf32>
    %28 = tpu.matmul %25, %27, %cst_28 {dimension_numbers = #tpu.dot_dimension_numbers<[1], [0], [0], [1], [0, 0, 1, 1], [], []>} : vector<8x4xbf16>, vector<4x384xbf16>, vector<8x384xf32> -> vector<8x384xf32>
    %29 = arith.addf %23, %28 : vector<8x384xf32>
    %c5 = arith.constant 5 : index
    %c0_29 = arith.constant 0 : index
    %c0_30 = arith.constant 0 : index
    %30 = vector.load %arg2[%c5, %c0_29, %c0_30] : memref<9x8x4xbf16, #tpu.memory_space<vmem>>, vector<1x8x4xbf16>
    %31 = vector.shape_cast %30 : vector<1x8x4xbf16> to vector<8x4xbf16>
    %c0_31 = arith.constant 0 : index
    %c0_32 = arith.constant 0 : index
    %c20 = arith.constant 20 : index
    %32 = vector.load %arg1[%c0_31, %c0_32, %c20] : memref<4x4x512xbf16, #tpu.memory_space<vmem>>, vector<1x4x384xbf16>
    %33 = vector.shape_cast %32 : vector<1x4x384xbf16> to vector<4x384xbf16>
    %cst_33 = arith.constant dense<0.000000e+00> : vector<8x384xf32>
    %34 = tpu.matmul %31, %33, %cst_33 {dimension_numbers = #tpu.dot_dimension_numbers<[1], [0], [0], [1], [0, 0, 1, 1], [], []>} : vector<8x4xbf16>, vector<4x384xbf16>, vector<8x384xf32> -> vector<8x384xf32>
    %35 = arith.addf %29, %34 : vector<8x384xf32>
    %c6 = arith.constant 6 : index
    %c0_34 = arith.constant 0 : index
    %c0_35 = arith.constant 0 : index
    %36 = vector.load %arg2[%c6, %c0_34, %c0_35] : memref<9x8x4xbf16, #tpu.memory_space<vmem>>, vector<1x8x4xbf16>
    %37 = vector.shape_cast %36 : vector<1x8x4xbf16> to vector<8x4xbf16>
    %c0_36 = arith.constant 0 : index
    %c0_37 = arith.constant 0 : index
    %c36 = arith.constant 36 : index
    %38 = vector.load %arg1[%c0_36, %c0_37, %c36] : memref<4x4x512xbf16, #tpu.memory_space<vmem>>, vector<1x4x384xbf16>
    %39 = vector.shape_cast %38 : vector<1x4x384xbf16> to vector<4x384xbf16>
    %cst_38 = arith.constant dense<0.000000e+00> : vector<8x384xf32>
    %40 = tpu.matmul %37, %39, %cst_38 {dimension_numbers = #tpu.dot_dimension_numbers<[1], [0], [0], [1], [0, 0, 1, 1], [], []>} : vector<8x4xbf16>, vector<4x384xbf16>, vector<8x384xf32> -> vector<8x384xf32>
    %41 = arith.addf %35, %40 : vector<8x384xf32>
    %c7 = arith.constant 7 : index
    %c0_39 = arith.constant 0 : index
    %c0_40 = arith.constant 0 : index
    %42 = vector.load %arg2[%c7, %c0_39, %c0_40] : memref<9x8x4xbf16, #tpu.memory_space<vmem>>, vector<1x8x4xbf16>
    %43 = vector.shape_cast %42 : vector<1x8x4xbf16> to vector<8x4xbf16>
    %c0_41 = arith.constant 0 : index
    %c0_42 = arith.constant 0 : index
    %c37 = arith.constant 37 : index
    %44 = vector.load %arg1[%c0_41, %c0_42, %c37] : memref<4x4x512xbf16, #tpu.memory_space<vmem>>, vector<1x4x384xbf16>
    %45 = vector.shape_cast %44 : vector<1x4x384xbf16> to vector<4x384xbf16>
    %cst_43 = arith.constant dense<0.000000e+00> : vector<8x384xf32>
    %46 = tpu.matmul %43, %45, %cst_43 {dimension_numbers = #tpu.dot_dimension_numbers<[1], [0], [0], [1], [0, 0, 1, 1], [], []>} : vector<8x4xbf16>, vector<4x384xbf16>, vector<8x384xf32> -> vector<8x384xf32>
    %47 = arith.addf %41, %46 : vector<8x384xf32>
    %c8 = arith.constant 8 : index
    %c0_44 = arith.constant 0 : index
    %c0_45 = arith.constant 0 : index
    %48 = vector.load %arg2[%c8, %c0_44, %c0_45] : memref<9x8x4xbf16, #tpu.memory_space<vmem>>, vector<1x8x4xbf16>
    %49 = vector.shape_cast %48 : vector<1x8x4xbf16> to vector<8x4xbf16>
    %c0_46 = arith.constant 0 : index
    %c0_47 = arith.constant 0 : index
    %c38 = arith.constant 38 : index
    %50 = vector.load %arg1[%c0_46, %c0_47, %c38] : memref<4x4x512xbf16, #tpu.memory_space<vmem>>, vector<1x4x384xbf16>
    %51 = vector.shape_cast %50 : vector<1x4x384xbf16> to vector<4x384xbf16>
    %cst_48 = arith.constant dense<0.000000e+00> : vector<8x384xf32>
    %52 = tpu.matmul %49, %51, %cst_48 {dimension_numbers = #tpu.dot_dimension_numbers<[1], [0], [0], [1], [0, 0, 1, 1], [], []>} : vector<8x4xbf16>, vector<4x384xbf16>, vector<8x384xf32> -> vector<8x384xf32>
    %53 = arith.addf %47, %52 : vector<8x384xf32>
    %54 = vector.broadcast %0 : vector<8x1xf32> to vector<8x384xf32>
    %55 = arith.addf %53, %54 : vector<8x384xf32>
    %c0_49 = arith.constant 0 : index
    %c0_50 = arith.constant 0 : index
    %c0_51 = arith.constant 0 : index
    %56 = vector.load %arg4[%c0_49, %c0_50, %c0_51] : memref<4x8x384xf32, #tpu.memory_space<vmem>>, vector<1x8x384xf32>
    %57 = vector.shape_cast %56 : vector<1x8x384xf32> to vector<8x384xf32>
    %58 = vector.shape_cast %55 : vector<8x384xf32> to vector<1x8x384xf32>
    tpu.vector_store %arg4[%c0_49, %c0_50, %c0_51], %58 {strides = array<i32>} : memref<4x8x384xf32, #tpu.memory_space<vmem>>, vector<1x8x384xf32>,
    %c0_52 = arith.constant 0 : index
    %c0_53 = arith.constant 0 : index
    %c0_54 = arith.constant 0 : index
    %59 = vector.load %arg2[%c0_52, %c0_53, %c0_54] : memref<9x8x4xbf16, #tpu.memory_space<vmem>>, vector<1x8x4xbf16>
    %60 = vector.shape_cast %59 : vector<1x8x4xbf16> to vector<8x4xbf16>
    %c1_55 = arith.constant 1 : index
    %c0_56 = arith.constant 0 : index
    %c0_57 = arith.constant 0 : index
    %61 = vector.load %arg1[%c1_55, %c0_56, %c0_57] : memref<4x4x512xbf16, #tpu.memory_space<vmem>>, vector<1x4x384xbf16>
    %62 = vector.shape_cast %61 : vector<1x4x384xbf16> to vector<4x384xbf16>
    %cst_58 = arith.constant dense<0.000000e+00> : vector<8x384xf32>
    %63 = tpu.matmul %60, %62, %cst_58 {dimension_numbers = #tpu.dot_dimension_numbers<[1], [0], [0], [1], [0, 0, 1, 1], [], []>} : vector<8x4xbf16>, vector<4x384xbf16>, vector<8x384xf32> -> vector<8x384xf32>
    %c1_59 = arith.constant 1 : index
    %c0_60 = arith.constant 0 : index
    %c0_61 = arith.constant 0 : index
    %64 = vector.load %arg2[%c1_59, %c0_60, %c0_61] : memref<9x8x4xbf16, #tpu.memory_space<vmem>>, vector<1x8x4xbf16>
    %65 = vector.shape_cast %64 : vector<1x8x4xbf16> to vector<8x4xbf16>
    %c1_62 = arith.constant 1 : index
    %c0_63 = arith.constant 0 : index
    %c1_64 = arith.constant 1 : index
    %66 = vector.load %arg1[%c1_62, %c0_63, %c1_64] : memref<4x4x512xbf16, #tpu.memory_space<vmem>>, vector<1x4x384xbf16>
    %67 = vector.shape_cast %66 : vector<1x4x384xbf16> to vector<4x384xbf16>
    %cst_65 = arith.constant dense<0.000000e+00> : vector<8x384xf32>
    %68 = tpu.matmul %65, %67, %cst_65 {dimension_numbers = #tpu.dot_dimension_numbers<[1], [0], [0], [1], [0, 0, 1, 1], [], []>} : vector<8x4xbf16>, vector<4x384xbf16>, vector<8x384xf32> -> vector<8x384xf32>
    %69 = arith.addf %63, %68 : vector<8x384xf32>
    %c2_66 = arith.constant 2 : index
    %c0_67 = arith.constant 0 : index
    %c0_68 = arith.constant 0 : index
    %70 = vector.load %arg2[%c2_66, %c0_67, %c0_68] : memref<9x8x4xbf16, #tpu.memory_space<vmem>>, vector<1x8x4xbf16>
    %71 = vector.shape_cast %70 : vector<1x8x4xbf16> to vector<8x4xbf16>
    %c1_69 = arith.constant 1 : index
    %c0_70 = arith.constant 0 : index
    %c2_71 = arith.constant 2 : index
    %72 = vector.load %arg1[%c1_69, %c0_70, %c2_71] : memref<4x4x512xbf16, #tpu.memory_space<vmem>>, vector<1x4x384xbf16>
    %73 = vector.shape_cast %72 : vector<1x4x384xbf16> to vector<4x384xbf16>
    %cst_72 = arith.constant dense<0.000000e+00> : vector<8x384xf32>
    %74 = tpu.matmul %71, %73, %cst_72 {dimension_numbers = #tpu.dot_dimension_numbers<[1], [0], [0], [1], [0, 0, 1, 1], [], []>} : vector<8x4xbf16>, vector<4x384xbf16>, vector<8x384xf32> -> vector<8x384xf32>
    %75 = arith.addf %69, %74 : vector<8x384xf32>
    %c3_73 = arith.constant 3 : index
    %c0_74 = arith.constant 0 : index
    %c0_75 = arith.constant 0 : index
    %76 = vector.load %arg2[%c3_73, %c0_74, %c0_75] : memref<9x8x4xbf16, #tpu.memory_space<vmem>>, vector<1x8x4xbf16>
    %77 = vector.shape_cast %76 : vector<1x8x4xbf16> to vector<8x4xbf16>
    %c1_76 = arith.constant 1 : index
    %c0_77 = arith.constant 0 : index
    %c18_78 = arith.constant 18 : index
    %78 = vector.load %arg1[%c1_76, %c0_77, %c18_78] : memref<4x4x512xbf16, #tpu.memory_space<vmem>>, vector<1x4x384xbf16>
    %79 = vector.shape_cast %78 : vector<1x4x384xbf16> to vector<4x384xbf16>
    %cst_79 = arith.constant dense<0.000000e+00> : vector<8x384xf32>
    %80 = tpu.matmul %77, %79, %cst_79 {dimension_numbers = #tpu.dot_dimension_numbers<[1], [0], [0], [1], [0, 0, 1, 1], [], []>} : vector<8x4xbf16>, vector<4x384xbf16>, vector<8x384xf32> -> vector<8x384xf32>
    %81 = arith.addf %75, %80 : vector<8x384xf32>
    %c4_80 = arith.constant 4 : index
    %c0_81 = arith.constant 0 : index
    %c0_82 = arith.constant 0 : index
    %82 = vector.load %arg2[%c4_80, %c0_81, %c0_82] : memref<9x8x4xbf16, #tpu.memory_space<vmem>>, vector<1x8x4xbf16>
    %83 = vector.shape_cast %82 : vector<1x8x4xbf16> to vector<8x4xbf16>
    %c1_83 = arith.constant 1 : index
    %c0_84 = arith.constant 0 : index
    %c19_85 = arith.constant 19 : index
    %84 = vector.load %arg1[%c1_83, %c0_84, %c19_85] : memref<4x4x512xbf16, #tpu.memory_space<vmem>>, vector<1x4x384xbf16>
    %85 = vector.shape_cast %84 : vector<1x4x384xbf16> to vector<4x384xbf16>
    %cst_86 = arith.constant dense<0.000000e+00> : vector<8x384xf32>
    %86 = tpu.matmul %83, %85, %cst_86 {dimension_numbers = #tpu.dot_dimension_numbers<[1], [0], [0], [1], [0, 0, 1, 1], [], []>} : vector<8x4xbf16>, vector<4x384xbf16>, vector<8x384xf32> -> vector<8x384xf32>
    %87 = arith.addf %81, %86 : vector<8x384xf32>
    %c5_87 = arith.constant 5 : index
    %c0_88 = arith.constant 0 : index
    %c0_89 = arith.constant 0 : index
    %88 = vector.load %arg2[%c5_87, %c0_88, %c0_89] : memref<9x8x4xbf16, #tpu.memory_space<vmem>>, vector<1x8x4xbf16>
    %89 = vector.shape_cast %88 : vector<1x8x4xbf16> to vector<8x4xbf16>
    %c1_90 = arith.constant 1 : index
    %c0_91 = arith.constant 0 : index
    %c20_92 = arith.constant 20 : index
    %90 = vector.load %arg1[%c1_90, %c0_91, %c20_92] : memref<4x4x512xbf16, #tpu.memory_space<vmem>>, vector<1x4x384xbf16>
    %91 = vector.shape_cast %90 : vector<1x4x384xbf16> to vector<4x384xbf16>
    %cst_93 = arith.constant dense<0.000000e+00> : vector<8x384xf32>
    %92 = tpu.matmul %89, %91, %cst_93 {dimension_numbers = #tpu.dot_dimension_numbers<[1], [0], [0], [1], [0, 0, 1, 1], [], []>} : vector<8x4xbf16>, vector<4x384xbf16>, vector<8x384xf32> -> vector<8x384xf32>
    %93 = arith.addf %87, %92 : vector<8x384xf32>
    %c6_94 = arith.constant 6 : index
    %c0_95 = arith.constant 0 : index
    %c0_96 = arith.constant 0 : index
    %94 = vector.load %arg2[%c6_94, %c0_95, %c0_96] : memref<9x8x4xbf16, #tpu.memory_space<vmem>>, vector<1x8x4xbf16>
    %95 = vector.shape_cast %94 : vector<1x8x4xbf16> to vector<8x4xbf16>
    %c1_97 = arith.constant 1 : index
    %c0_98 = arith.constant 0 : index
    %c36_99 = arith.constant 36 : index
    %96 = vector.load %arg1[%c1_97, %c0_98, %c36_99] : memref<4x4x512xbf16, #tpu.memory_space<vmem>>, vector<1x4x384xbf16>
    %97 = vector.shape_cast %96 : vector<1x4x384xbf16> to vector<4x384xbf16>
    %cst_100 = arith.constant dense<0.000000e+00> : vector<8x384xf32>
    %98 = tpu.matmul %95, %97, %cst_100 {dimension_numbers = #tpu.dot_dimension_numbers<[1], [0], [0], [1], [0, 0, 1, 1], [], []>} : vector<8x4xbf16>, vector<4x384xbf16>, vector<8x384xf32> -> vector<8x384xf32>
    %99 = arith.addf %93, %98 : vector<8x384xf32>
    %c7_101 = arith.constant 7 : index
    %c0_102 = arith.constant 0 : index
    %c0_103 = arith.constant 0 : index
    %100 = vector.load %arg2[%c7_101, %c0_102, %c0_103] : memref<9x8x4xbf16, #tpu.memory_space<vmem>>, vector<1x8x4xbf16>
    %101 = vector.shape_cast %100 : vector<1x8x4xbf16> to vector<8x4xbf16>
    %c1_104 = arith.constant 1 : index
    %c0_105 = arith.constant 0 : index
    %c37_106 = arith.constant 37 : index
    %102 = vector.load %arg1[%c1_104, %c0_105, %c37_106] : memref<4x4x512xbf16, #tpu.memory_space<vmem>>, vector<1x4x384xbf16>
    %103 = vector.shape_cast %102 : vector<1x4x384xbf16> to vector<4x384xbf16>
    %cst_107 = arith.constant dense<0.000000e+00> : vector<8x384xf32>
    %104 = tpu.matmul %101, %103, %cst_107 {dimension_numbers = #tpu.dot_dimension_numbers<[1], [0], [0], [1], [0, 0, 1, 1], [], []>} : vector<8x4xbf16>, vector<4x384xbf16>, vector<8x384xf32> -> vector<8x384xf32>
    %105 = arith.addf %99, %104 : vector<8x384xf32>
    %c8_108 = arith.constant 8 : index
    %c0_109 = arith.constant 0 : index
    %c0_110 = arith.constant 0 : index
    %106 = vector.load %arg2[%c8_108, %c0_109, %c0_110] : memref<9x8x4xbf16, #tpu.memory_space<vmem>>, vector<1x8x4xbf16>
    %107 = vector.shape_cast %106 : vector<1x8x4xbf16> to vector<8x4xbf16>
    %c1_111 = arith.constant 1 : index
    %c0_112 = arith.constant 0 : index
    %c38_113 = arith.constant 38 : index
    %108 = vector.load %arg1[%c1_111, %c0_112, %c38_113] : memref<4x4x512xbf16, #tpu.memory_space<vmem>>, vector<1x4x384xbf16>
    %109 = vector.shape_cast %108 : vector<1x4x384xbf16> to vector<4x384xbf16>
    %cst_114 = arith.constant dense<0.000000e+00> : vector<8x384xf32>
    %110 = tpu.matmul %107, %109, %cst_114 {dimension_numbers = #tpu.dot_dimension_numbers<[1], [0], [0], [1], [0, 0, 1, 1], [], []>} : vector<8x4xbf16>, vector<4x384xbf16>, vector<8x384xf32> -> vector<8x384xf32>
    %111 = arith.addf %105, %110 : vector<8x384xf32>
    %112 = vector.broadcast %0 : vector<8x1xf32> to vector<8x384xf32>
    %113 = arith.addf %111, %112 : vector<8x384xf32>
    %c1_115 = arith.constant 1 : index
    %c0_116 = arith.constant 0 : index
    %c0_117 = arith.constant 0 : index
    %114 = vector.load %arg4[%c1_115, %c0_116, %c0_117] : memref<4x8x384xf32, #tpu.memory_space<vmem>>, vector<1x8x384xf32>
    %115 = vector.shape_cast %114 : vector<1x8x384xf32> to vector<8x384xf32>
    %116 = vector.shape_cast %113 : vector<8x384xf32> to vector<1x8x384xf32>
    tpu.vector_store %arg4[%c1_115, %c0_116, %c0_117], %116 {strides = array<i32>} : memref<4x8x384xf32, #tpu.memory_space<vmem>>, vector<1x8x384xf32>,
    %c0_118 = arith.constant 0 : index
    %c0_119 = arith.constant 0 : index
    %c0_120 = arith.constant 0 : index
    %117 = vector.load %arg2[%c0_118, %c0_119, %c0_120] : memref<9x8x4xbf16, #tpu.memory_space<vmem>>, vector<1x8x4xbf16>
    %118 = vector.shape_cast %117 : vector<1x8x4xbf16> to vector<8x4xbf16>
    %c2_121 = arith.constant 2 : index
    %c0_122 = arith.constant 0 : index
    %c0_123 = arith.constant 0 : index
    %119 = vector.load %arg1[%c2_121, %c0_122, %c0_123] : memref<4x4x512xbf16, #tpu.memory_space<vmem>>, vector<1x4x384xbf16>
    %120 = vector.shape_cast %119 : vector<1x4x384xbf16> to vector<4x384xbf16>
    %cst_124 = arith.constant dense<0.000000e+00> : vector<8x384xf32>
    %121 = tpu.matmul %118, %120, %cst_124 {dimension_numbers = #tpu.dot_dimension_numbers<[1], [0], [0], [1], [0, 0, 1, 1], [], []>} : vector<8x4xbf16>, vector<4x384xbf16>, vector<8x384xf32> -> vector<8x384xf32>
    %c1_125 = arith.constant 1 : index
    %c0_126 = arith.constant 0 : index
    %c0_127 = arith.constant 0 : index
    %122 = vector.load %arg2[%c1_125, %c0_126, %c0_127] : memref<9x8x4xbf16, #tpu.memory_space<vmem>>, vector<1x8x4xbf16>
    %123 = vector.shape_cast %122 : vector<1x8x4xbf16> to vector<8x4xbf16>
    %c2_128 = arith.constant 2 : index
    %c0_129 = arith.constant 0 : index
    %c1_130 = arith.constant 1 : index
    %124 = vector.load %arg1[%c2_128, %c0_129, %c1_130] : memref<4x4x512xbf16, #tpu.memory_space<vmem>>, vector<1x4x384xbf16>
    %125 = vector.shape_cast %124 : vector<1x4x384xbf16> to vector<4x384xbf16>
    %cst_131 = arith.constant dense<0.000000e+00> : vector<8x384xf32>
    %126 = tpu.matmul %123, %125, %cst_131 {dimension_numbers = #tpu.dot_dimension_numbers<[1], [0], [0], [1], [0, 0, 1, 1], [], []>} : vector<8x4xbf16>, vector<4x384xbf16>, vector<8x384xf32> -> vector<8x384xf32>
    %127 = arith.addf %121, %126 : vector<8x384xf32>
    %c2_132 = arith.constant 2 : index
    %c0_133 = arith.constant 0 : index
    %c0_134 = arith.constant 0 : index
    %128 = vector.load %arg2[%c2_132, %c0_133, %c0_134] : memref<9x8x4xbf16, #tpu.memory_space<vmem>>, vector<1x8x4xbf16>
    %129 = vector.shape_cast %128 : vector<1x8x4xbf16> to vector<8x4xbf16>
    %c2_135 = arith.constant 2 : index
    %c0_136 = arith.constant 0 : index
    %c2_137 = arith.constant 2 : index
    %130 = vector.load %arg1[%c2_135, %c0_136, %c2_137] : memref<4x4x512xbf16, #tpu.memory_space<vmem>>, vector<1x4x384xbf16>
    %131 = vector.shape_cast %130 : vector<1x4x384xbf16> to vector<4x384xbf16>
    %cst_138 = arith.constant dense<0.000000e+00> : vector<8x384xf32>
    %132 = tpu.matmul %129, %131, %cst_138 {dimension_numbers = #tpu.dot_dimension_numbers<[1], [0], [0], [1], [0, 0, 1, 1], [], []>} : vector<8x4xbf16>, vector<4x384xbf16>, vector<8x384xf32> -> vector<8x384xf32>
    %133 = arith.addf %127, %132 : vector<8x384xf32>
    %c3_139 = arith.constant 3 : index
    %c0_140 = arith.constant 0 : index
    %c0_141 = arith.constant 0 : index
    %134 = vector.load %arg2[%c3_139, %c0_140, %c0_141] : memref<9x8x4xbf16, #tpu.memory_space<vmem>>, vector<1x8x4xbf16>
    %135 = vector.shape_cast %134 : vector<1x8x4xbf16> to vector<8x4xbf16>
    %c2_142 = arith.constant 2 : index
    %c0_143 = arith.constant 0 : index
    %c18_144 = arith.constant 18 : index
    %136 = vector.load %arg1[%c2_142, %c0_143, %c18_144] : memref<4x4x512xbf16, #tpu.memory_space<vmem>>, vector<1x4x384xbf16>
    %137 = vector.shape_cast %136 : vector<1x4x384xbf16> to vector<4x384xbf16>
    %cst_145 = arith.constant dense<0.000000e+00> : vector<8x384xf32>
    %138 = tpu.matmul %135, %137, %cst_145 {dimension_numbers = #tpu.dot_dimension_numbers<[1], [0], [0], [1], [0, 0, 1, 1], [], []>} : vector<8x4xbf16>, vector<4x384xbf16>, vector<8x384xf32> -> vector<8x384xf32>
    %139 = arith.addf %133, %138 : vector<8x384xf32>
    %c4_146 = arith.constant 4 : index
    %c0_147 = arith.constant 0 : index
    %c0_148 = arith.constant 0 : index
    %140 = vector.load %arg2[%c4_146, %c0_147, %c0_148] : memref<9x8x4xbf16, #tpu.memory_space<vmem>>, vector<1x8x4xbf16>
    %141 = vector.shape_cast %140 : vector<1x8x4xbf16> to vector<8x4xbf16>
    %c2_149 = arith.constant 2 : index
    %c0_150 = arith.constant 0 : index
    %c19_151 = arith.constant 19 : index
    %142 = vector.load %arg1[%c2_149, %c0_150, %c19_151] : memref<4x4x512xbf16, #tpu.memory_space<vmem>>, vector<1x4x384xbf16>
    %143 = vector.shape_cast %142 : vector<1x4x384xbf16> to vector<4x384xbf16>
    %cst_152 = arith.constant dense<0.000000e+00> : vector<8x384xf32>
    %144 = tpu.matmul %141, %143, %cst_152 {dimension_numbers = #tpu.dot_dimension_numbers<[1], [0], [0], [1], [0, 0, 1, 1], [], []>} : vector<8x4xbf16>, vector<4x384xbf16>, vector<8x384xf32> -> vector<8x384xf32>
    %145 = arith.addf %139, %144 : vector<8x384xf32>
    %c5_153 = arith.constant 5 : index
    %c0_154 = arith.constant 0 : index
    %c0_155 = arith.constant 0 : index
    %146 = vector.load %arg2[%c5_153, %c0_154, %c0_155] : memref<9x8x4xbf16, #tpu.memory_space<vmem>>, vector<1x8x4xbf16>
    %147 = vector.shape_cast %146 : vector<1x8x4xbf16> to vector<8x4xbf16>
    %c2_156 = arith.constant 2 : index
    %c0_157 = arith.constant 0 : index
    %c20_158 = arith.constant 20 : index
    %148 = vector.load %arg1[%c2_156, %c0_157, %c20_158] : memref<4x4x512xbf16, #tpu.memory_space<vmem>>, vector<1x4x384xbf16>
    %149 = vector.shape_cast %148 : vector<1x4x384xbf16> to vector<4x384xbf16>
    %cst_159 = arith.constant dense<0.000000e+00> : vector<8x384xf32>
    %150 = tpu.matmul %147, %149, %cst_159 {dimension_numbers = #tpu.dot_dimension_numbers<[1], [0], [0], [1], [0, 0, 1, 1], [], []>} : vector<8x4xbf16>, vector<4x384xbf16>, vector<8x384xf32> -> vector<8x384xf32>
    %151 = arith.addf %145, %150 : vector<8x384xf32>
    %c6_160 = arith.constant 6 : index
    %c0_161 = arith.constant 0 : index
    %c0_162 = arith.constant 0 : index
    %152 = vector.load %arg2[%c6_160, %c0_161, %c0_162] : memref<9x8x4xbf16, #tpu.memory_space<vmem>>, vector<1x8x4xbf16>
    %153 = vector.shape_cast %152 : vector<1x8x4xbf16> to vector<8x4xbf16>
    %c2_163 = arith.constant 2 : index
    %c0_164 = arith.constant 0 : index
    %c36_165 = arith.constant 36 : index
    %154 = vector.load %arg1[%c2_163, %c0_164, %c36_165] : memref<4x4x512xbf16, #tpu.memory_space<vmem>>, vector<1x4x384xbf16>
    %155 = vector.shape_cast %154 : vector<1x4x384xbf16> to vector<4x384xbf16>
    %cst_166 = arith.constant dense<0.000000e+00> : vector<8x384xf32>
    %156 = tpu.matmul %153, %155, %cst_166 {dimension_numbers = #tpu.dot_dimension_numbers<[1], [0], [0], [1], [0, 0, 1, 1], [], []>} : vector<8x4xbf16>, vector<4x384xbf16>, vector<8x384xf32> -> vector<8x384xf32>
    %157 = arith.addf %151, %156 : vector<8x384xf32>
    %c7_167 = arith.constant 7 : index
    %c0_168 = arith.constant 0 : index
    %c0_169 = arith.constant 0 : index
    %158 = vector.load %arg2[%c7_167, %c0_168, %c0_169] : memref<9x8x4xbf16, #tpu.memory_space<vmem>>, vector<1x8x4xbf16>
    %159 = vector.shape_cast %158 : vector<1x8x4xbf16> to vector<8x4xbf16>
    %c2_170 = arith.constant 2 : index
    %c0_171 = arith.constant 0 : index
    %c37_172 = arith.constant 37 : index
    %160 = vector.load %arg1[%c2_170, %c0_171, %c37_172] : memref<4x4x512xbf16, #tpu.memory_space<vmem>>, vector<1x4x384xbf16>
    %161 = vector.shape_cast %160 : vector<1x4x384xbf16> to vector<4x384xbf16>
    %cst_173 = arith.constant dense<0.000000e+00> : vector<8x384xf32>
    %162 = tpu.matmul %159, %161, %cst_173 {dimension_numbers = #tpu.dot_dimension_numbers<[1], [0], [0], [1], [0, 0, 1, 1], [], []>} : vector<8x4xbf16>, vector<4x384xbf16>, vector<8x384xf32> -> vector<8x384xf32>
    %163 = arith.addf %157, %162 : vector<8x384xf32>
    %c8_174 = arith.constant 8 : index
    %c0_175 = arith.constant 0 : index
    %c0_176 = arith.constant 0 : index
    %164 = vector.load %arg2[%c8_174, %c0_175, %c0_176] : memref<9x8x4xbf16, #tpu.memory_space<vmem>>, vector<1x8x4xbf16>
    %165 = vector.shape_cast %164 : vector<1x8x4xbf16> to vector<8x4xbf16>
    %c2_177 = arith.constant 2 : index
    %c0_178 = arith.constant 0 : index
    %c38_179 = arith.constant 38 : index
    %166 = vector.load %arg1[%c2_177, %c0_178, %c38_179] : memref<4x4x512xbf16, #tpu.memory_space<vmem>>, vector<1x4x384xbf16>
    %167 = vector.shape_cast %166 : vector<1x4x384xbf16> to vector<4x384xbf16>
    %cst_180 = arith.constant dense<0.000000e+00> : vector<8x384xf32>
    %168 = tpu.matmul %165, %167, %cst_180 {dimension_numbers = #tpu.dot_dimension_numbers<[1], [0], [0], [1], [0, 0, 1, 1], [], []>} : vector<8x4xbf16>, vector<4x384xbf16>, vector<8x384xf32> -> vector<8x384xf32>
    %169 = arith.addf %163, %168 : vector<8x384xf32>
    %170 = vector.broadcast %0 : vector<8x1xf32> to vector<8x384xf32>
    %171 = arith.addf %169, %170 : vector<8x384xf32>
    %c2_181 = arith.constant 2 : index
    %c0_182 = arith.constant 0 : index
    %c0_183 = arith.constant 0 : index
    %172 = vector.load %arg4[%c2_181, %c0_182, %c0_183] : memref<4x8x384xf32, #tpu.memory_space<vmem>>, vector<1x8x384xf32>
    %173 = vector.shape_cast %172 : vector<1x8x384xf32> to vector<8x384xf32>
    %174 = vector.shape_cast %171 : vector<8x384xf32> to vector<1x8x384xf32>
    tpu.vector_store %arg4[%c2_181, %c0_182, %c0_183], %174 {strides = array<i32>} : memref<4x8x384xf32, #tpu.memory_space<vmem>>, vector<1x8x384xf32>,
    %c0_184 = arith.constant 0 : index
    %c0_185 = arith.constant 0 : index
    %c0_186 = arith.constant 0 : index
    %175 = vector.load %arg2[%c0_184, %c0_185, %c0_186] : memref<9x8x4xbf16, #tpu.memory_space<vmem>>, vector<1x8x4xbf16>
    %176 = vector.shape_cast %175 : vector<1x8x4xbf16> to vector<8x4xbf16>
    %c3_187 = arith.constant 3 : index
    %c0_188 = arith.constant 0 : index
    %c0_189 = arith.constant 0 : index
    %177 = vector.load %arg1[%c3_187, %c0_188, %c0_189] : memref<4x4x512xbf16, #tpu.memory_space<vmem>>, vector<1x4x384xbf16>
    %178 = vector.shape_cast %177 : vector<1x4x384xbf16> to vector<4x384xbf16>
    %cst_190 = arith.constant dense<0.000000e+00> : vector<8x384xf32>
    %179 = tpu.matmul %176, %178, %cst_190 {dimension_numbers = #tpu.dot_dimension_numbers<[1], [0], [0], [1], [0, 0, 1, 1], [], []>} : vector<8x4xbf16>, vector<4x384xbf16>, vector<8x384xf32> -> vector<8x384xf32>
    %c1_191 = arith.constant 1 : index
    %c0_192 = arith.constant 0 : index
    %c0_193 = arith.constant 0 : index
    %180 = vector.load %arg2[%c1_191, %c0_192, %c0_193] : memref<9x8x4xbf16, #tpu.memory_space<vmem>>, vector<1x8x4xbf16>
    %181 = vector.shape_cast %180 : vector<1x8x4xbf16> to vector<8x4xbf16>
    %c3_194 = arith.constant 3 : index
    %c0_195 = arith.constant 0 : index
    %c1_196 = arith.constant 1 : index
    %182 = vector.load %arg1[%c3_194, %c0_195, %c1_196] : memref<4x4x512xbf16, #tpu.memory_space<vmem>>, vector<1x4x384xbf16>
    %183 = vector.shape_cast %182 : vector<1x4x384xbf16> to vector<4x384xbf16>
    %cst_197 = arith.constant dense<0.000000e+00> : vector<8x384xf32>
    %184 = tpu.matmul %181, %183, %cst_197 {dimension_numbers = #tpu.dot_dimension_numbers<[1], [0], [0], [1], [0, 0, 1, 1], [], []>} : vector<8x4xbf16>, vector<4x384xbf16>, vector<8x384xf32> -> vector<8x384xf32>
    %185 = arith.addf %179, %184 : vector<8x384xf32>
    %c2_198 = arith.constant 2 : index
    %c0_199 = arith.constant 0 : index
    %c0_200 = arith.constant 0 : index
    %186 = vector.load %arg2[%c2_198, %c0_199, %c0_200] : memref<9x8x4xbf16, #tpu.memory_space<vmem>>, vector<1x8x4xbf16>
    %187 = vector.shape_cast %186 : vector<1x8x4xbf16> to vector<8x4xbf16>
    %c3_201 = arith.constant 3 : index
    %c0_202 = arith.constant 0 : index
    %c2_203 = arith.constant 2 : index
    %188 = vector.load %arg1[%c3_201, %c0_202, %c2_203] : memref<4x4x512xbf16, #tpu.memory_space<vmem>>, vector<1x4x384xbf16>
    %189 = vector.shape_cast %188 : vector<1x4x384xbf16> to vector<4x384xbf16>
    %cst_204 = arith.constant dense<0.000000e+00> : vector<8x384xf32>
    %190 = tpu.matmul %187, %189, %cst_204 {dimension_numbers = #tpu.dot_dimension_numbers<[1], [0], [0], [1], [0, 0, 1, 1], [], []>} : vector<8x4xbf16>, vector<4x384xbf16>, vector<8x384xf32> -> vector<8x384xf32>
    %191 = arith.addf %185, %190 : vector<8x384xf32>
    %c3_205 = arith.constant 3 : index
    %c0_206 = arith.constant 0 : index
    %c0_207 = arith.constant 0 : index
    %192 = vector.load %arg2[%c3_205, %c0_206, %c0_207] : memref<9x8x4xbf16, #tpu.memory_space<vmem>>, vector<1x8x4xbf16>
    %193 = vector.shape_cast %192 : vector<1x8x4xbf16> to vector<8x4xbf16>
    %c3_208 = arith.constant 3 : index
    %c0_209 = arith.constant 0 : index
    %c18_210 = arith.constant 18 : index
    %194 = vector.load %arg1[%c3_208, %c0_209, %c18_210] : memref<4x4x512xbf16, #tpu.memory_space<vmem>>, vector<1x4x384xbf16>
    %195 = vector.shape_cast %194 : vector<1x4x384xbf16> to vector<4x384xbf16>
    %cst_211 = arith.constant dense<0.000000e+00> : vector<8x384xf32>
    %196 = tpu.matmul %193, %195, %cst_211 {dimension_numbers = #tpu.dot_dimension_numbers<[1], [0], [0], [1], [0, 0, 1, 1], [], []>} : vector<8x4xbf16>, vector<4x384xbf16>, vector<8x384xf32> -> vector<8x384xf32>
    %197 = arith.addf %191, %196 : vector<8x384xf32>
    %c4_212 = arith.constant 4 : index
    %c0_213 = arith.constant 0 : index
    %c0_214 = arith.constant 0 : index
    %198 = vector.load %arg2[%c4_212, %c0_213, %c0_214] : memref<9x8x4xbf16, #tpu.memory_space<vmem>>, vector<1x8x4xbf16>
    %199 = vector.shape_cast %198 : vector<1x8x4xbf16> to vector<8x4xbf16>
    %c3_215 = arith.constant 3 : index
    %c0_216 = arith.constant 0 : index
    %c19_217 = arith.constant 19 : index
    %200 = vector.load %arg1[%c3_215, %c0_216, %c19_217] : memref<4x4x512xbf16, #tpu.memory_space<vmem>>, vector<1x4x384xbf16>
    %201 = vector.shape_cast %200 : vector<1x4x384xbf16> to vector<4x384xbf16>
    %cst_218 = arith.constant dense<0.000000e+00> : vector<8x384xf32>
    %202 = tpu.matmul %199, %201, %cst_218 {dimension_numbers = #tpu.dot_dimension_numbers<[1], [0], [0], [1], [0, 0, 1, 1], [], []>} : vector<8x4xbf16>, vector<4x384xbf16>, vector<8x384xf32> -> vector<8x384xf32>
    %203 = arith.addf %197, %202 : vector<8x384xf32>
    %c5_219 = arith.constant 5 : index
    %c0_220 = arith.constant 0 : index
    %c0_221 = arith.constant 0 : index
    %204 = vector.load %arg2[%c5_219, %c0_220, %c0_221] : memref<9x8x4xbf16, #tpu.memory_space<vmem>>, vector<1x8x4xbf16>
    %205 = vector.shape_cast %204 : vector<1x8x4xbf16> to vector<8x4xbf16>
    %c3_222 = arith.constant 3 : index
    %c0_223 = arith.constant 0 : index
    %c20_224 = arith.constant 20 : index
    %206 = vector.load %arg1[%c3_222, %c0_223, %c20_224] : memref<4x4x512xbf16, #tpu.memory_space<vmem>>, vector<1x4x384xbf16>
    %207 = vector.shape_cast %206 : vector<1x4x384xbf16> to vector<4x384xbf16>
    %cst_225 = arith.constant dense<0.000000e+00> : vector<8x384xf32>
    %208 = tpu.matmul %205, %207, %cst_225 {dimension_numbers = #tpu.dot_dimension_numbers<[1], [0], [0], [1], [0, 0, 1, 1], [], []>} : vector<8x4xbf16>, vector<4x384xbf16>, vector<8x384xf32> -> vector<8x384xf32>
    %209 = arith.addf %203, %208 : vector<8x384xf32>
    %c6_226 = arith.constant 6 : index
    %c0_227 = arith.constant 0 : index
    %c0_228 = arith.constant 0 : index
    %210 = vector.load %arg2[%c6_226, %c0_227, %c0_228] : memref<9x8x4xbf16, #tpu.memory_space<vmem>>, vector<1x8x4xbf16>
    %211 = vector.shape_cast %210 : vector<1x8x4xbf16> to vector<8x4xbf16>
    %c3_229 = arith.constant 3 : index
    %c0_230 = arith.constant 0 : index
    %c36_231 = arith.constant 36 : index
    %212 = vector.load %arg1[%c3_229, %c0_230, %c36_231] : memref<4x4x512xbf16, #tpu.memory_space<vmem>>, vector<1x4x384xbf16>
    %213 = vector.shape_cast %212 : vector<1x4x384xbf16> to vector<4x384xbf16>
    %cst_232 = arith.constant dense<0.000000e+00> : vector<8x384xf32>
    %214 = tpu.matmul %211, %213, %cst_232 {dimension_numbers = #tpu.dot_dimension_numbers<[1], [0], [0], [1], [0, 0, 1, 1], [], []>} : vector<8x4xbf16>, vector<4x384xbf16>, vector<8x384xf32> -> vector<8x384xf32>
    %215 = arith.addf %209, %214 : vector<8x384xf32>
    %c7_233 = arith.constant 7 : index
    %c0_234 = arith.constant 0 : index
    %c0_235 = arith.constant 0 : index
    %216 = vector.load %arg2[%c7_233, %c0_234, %c0_235] : memref<9x8x4xbf16, #tpu.memory_space<vmem>>, vector<1x8x4xbf16>
    %217 = vector.shape_cast %216 : vector<1x8x4xbf16> to vector<8x4xbf16>
    %c3_236 = arith.constant 3 : index
    %c0_237 = arith.constant 0 : index
    %c37_238 = arith.constant 37 : index
    %218 = vector.load %arg1[%c3_236, %c0_237, %c37_238] : memref<4x4x512xbf16, #tpu.memory_space<vmem>>, vector<1x4x384xbf16>
    %219 = vector.shape_cast %218 : vector<1x4x384xbf16> to vector<4x384xbf16>
    %cst_239 = arith.constant dense<0.000000e+00> : vector<8x384xf32>
    %220 = tpu.matmul %217, %219, %cst_239 {dimension_numbers = #tpu.dot_dimension_numbers<[1], [0], [0], [1], [0, 0, 1, 1], [], []>} : vector<8x4xbf16>, vector<4x384xbf16>, vector<8x384xf32> -> vector<8x384xf32>
    %221 = arith.addf %215, %220 : vector<8x384xf32>
    %c8_240 = arith.constant 8 : index
    %c0_241 = arith.constant 0 : index
    %c0_242 = arith.constant 0 : index
    %222 = vector.load %arg2[%c8_240, %c0_241, %c0_242] : memref<9x8x4xbf16, #tpu.memory_space<vmem>>, vector<1x8x4xbf16>
    %223 = vector.shape_cast %222 : vector<1x8x4xbf16> to vector<8x4xbf16>
    %c3_243 = arith.constant 3 : index
    %c0_244 = arith.constant 0 : index
    %c38_245 = arith.constant 38 : index
    %224 = vector.load %arg1[%c3_243, %c0_244, %c38_245] : memref<4x4x512xbf16, #tpu.memory_space<vmem>>, vector<1x4x384xbf16>
    %225 = vector.shape_cast %224 : vector<1x4x384xbf16> to vector<4x384xbf16>
    %cst_246 = arith.constant dense<0.000000e+00> : vector<8x384xf32>
    %226 = tpu.matmul %223, %225, %cst_246 {dimension_numbers = #tpu.dot_dimension_numbers<[1], [0], [0], [1], [0, 0, 1, 1], [], []>} : vector<8x4xbf16>, vector<4x384xbf16>, vector<8x384xf32> -> vector<8x384xf32>
    %227 = arith.addf %221, %226 : vector<8x384xf32>
    %228 = vector.broadcast %0 : vector<8x1xf32> to vector<8x384xf32>
    %229 = arith.addf %227, %228 : vector<8x384xf32>
    %c3_247 = arith.constant 3 : index
    %c0_248 = arith.constant 0 : index
    %c0_249 = arith.constant 0 : index
    %230 = vector.load %arg4[%c3_247, %c0_248, %c0_249] : memref<4x8x384xf32, #tpu.memory_space<vmem>>, vector<1x8x384xf32>
    %231 = vector.shape_cast %230 : vector<1x8x384xf32> to vector<8x384xf32>
    %232 = vector.shape_cast %229 : vector<8x384xf32> to vector<1x8x384xf32>
    tpu.vector_store %arg4[%c3_247, %c0_248, %c0_249], %232 {strides = array<i32>} : memref<4x8x384xf32, #tpu.memory_space<vmem>>, vector<1x8x384xf32>,
    return
  }
  func.func @transform_0(%arg0: i32) -> (i32, i32, i32) {
    %c0_i32 = arith.constant 0 : i32
    %c0_i32_0 = arith.constant 0 : i32
    %c0_i32_1 = arith.constant 0 : i32
    return %arg0, %c0_i32, %c0_i32_0 : i32, i32, i32
  }
  func.func @transform_1(%arg0: i32) -> (i32, i32, i32) {
    %c0_i32 = arith.constant 0 : i32
    %c0_i32_0 = arith.constant 0 : i32
    %c0_i32_1 = arith.constant 0 : i32
    %c0_i32_2 = arith.constant 0 : i32
    return %c0_i32, %c0_i32_0, %c0_i32_1 : i32, i32, i32
  }
  func.func @transform_2(%arg0: i32) -> (i32, i32) {
    %c0_i32 = arith.constant 0 : i32
    %c0_i32_0 = arith.constant 0 : i32
    %c0_i32_1 = arith.constant 0 : i32
    return %c0_i32, %c0_i32_0 : i32, i32
  }
  func.func @transform_3(%arg0: i32) -> (i32, i32, i32) {
    %c0_i32 = arith.constant 0 : i32
    %c0_i32_0 = arith.constant 0 : i32
    %c0_i32_1 = arith.constant 0 : i32
    return %arg0, %c0_i32, %c0_i32_0 : i32, i32, i32
  }
}

</mosaic_0001>

<bundles_post_ra>
// kernel: tsm_block_forward.1
= control target key start
LH: loop header
LB: loop body
LE: loop exit
PB: predicated region body
PF: predicated region fallthrough
CT: control target
= control target key end

     0   :  { %s5339_s12 = smov 0   ;;  %s6186_s0 = inlined_call_operand.vmem [shape: bf16[8,4,512], index: 0, kind: input, shape index: {}]   ;;  %s6187_s1 = inlined_call_operand.vmem [shape: bf16[9,8,4], index: 1, kind: input, shape index: {}]   ;;  %s6188_s2 = inlined_call_operand.vmem [shape: f32[8,1], index: 2, kind: input, shape index: {}]   ;;  %s6189_s3 = inlined_call_operand.vmem [shape: f32[8,8,384], index: 3, kind: output, shape index: {}]  }
   0x1 LB: > { %s4792_s13 = sadd.s32 4294967295, %s5305_s12   ;;  %p4796_p0 = scmp.ge.s32.totalorder %s5305_s12, 1  ;;  %s5305_s12 = sphi %s5339_s12, %s13_s12  }
   0x2   : > { %p139_p1 = scmp.lt.s32.totalorder %s5305_s12, 3 }
   0x4   : > { %p140_p2 = pnand %p4796_p0, %p139_p1 }
   0x5   : > { %s4797_s14 = sshll.u32 (!%p140_p2), %s4792_s13, 2  ;;  %v191_v0 = vlaneseq (!%p140_p2)  ;;  %v5307_v1 = vmov (!%p140_p2), 1983009808   ;;  %v5308_v5 = vmov (!%p140_p2), 0.0   ;;  %v5309_v6 = vmov (!%p140_p2), 0   ;;  %s5311_s19 = smov (!%p140_p2), 127  }
   0x6   : > { %143 = sbr.rel (%p140_p2) target bundleno = 642 (0x282), region = 32  ;;  %p166_p3 = scmp.lt.s32.totalorder (!%p140_p2), %s4797_s14, 7  ;;  %v189_v2 = vunpack.c.l.s4 (!%p140_p2), %v5307_v1  ;;  %5053 = vmatprep.subr.bf16.mxu1 (!%p140_p2), %v5308_v5  ;;  %262 = vmatprep.mubr.bf16.mxu0 (!%p140_p2), %v5309_v6  ;;  %vm5310_vm0 = vmmov (!%p140_p2), 0   ;;  %vm212_vm1 = vcmask (!%p140_p2), 1039360   ;;  %vm220_vm2 = vcmask (!%p140_p2), 1041408  }
   0x7   : > { %v192_v3 = vshrl.u32 (!%p140_p2), %v191_v0, 7  ;;  %5290 = vset.pattern.permute.xlu0 (!%p140_p2), %v5309_v6  ;;  %5055 = vmatprep.mubr.msk.bf16.mxu1 (!%p140_p2), %vm5310_vm0, %v5308_v5  ;;  %s5312_s20 = smov (!%p140_p2), 126   ;;  %s5313_s21 = smov (!%p140_p2), 110   ;;  %v4802_v33 = vld [vmem:[%s6187_s1 + $0x4] sm:$0xf] (!%p140_p2)  ;;  %vm216_vm3 = vcmask (!%p140_p2), 31744  }
   0x8   : > { %v190_v4 = vunpack.c.0.s8 (!%p140_p2), %v189_v2  ;;  %s5314_s22 = smov (!%p140_p2), 109   ;;  %s5315_s23 = smov (!%p140_p2), 108   ;;  %vm450_vm4 = vcmask (!%p140_p2), 1031168   ;;  %v181_v47 = vld [vmem:[%s6187_s1] sm:$0xf] (!%p140_p2)  ;;  %vm579_vm5 = vcmask (!%p140_p2), 900096  }
   0x9   : > { %s5316_s24 = smov (!%p140_p2), 92   ;;  %s5317_s25 = smov (!%p140_p2), 91   ;;  %v4809_v60 = vld [vmem:[%s6187_s1 + $0x8] sm:$0xf] (!%p140_p2)  ;;  %vm708_vm6 = vcmask (!%p140_p2), 891904   ;;  %vm837_vm7 = vcmask (!%p140_p2), 883712  }
   0xa   : > { %v5352_v7 = vsub.s32 (!%p140_p2), %v190_v4, %v192_v3  ;;  %s5318_s26 = smov (!%p140_p2), 90   ;;  %vm966_vm8 = vcmask (!%p140_p2), 752640   ;;  %vm1095_vm9 = vcmask (!%p140_p2), 744448   ;;  %vm1224_vm10 = vcmask (!%p140_p2), 736256  }
   0xd   : > { %s6191_s14 = smov (!%p166_p3, %s4797_s14), 7 }
   0xe   : > { %s4980_s15 = sshll.u32 %s6191_s14, 3  ;;  %s5269_s7 = smul.u32 24, %s6191_s14 }
   0xf   : > { %s5358_s18 = scalar_lea.vmem %s6186_s0, %s4980_s15 }
  0x10   : > { %v185_v8 = vld [vmem:[%s5358_s18] sm:$0xff]  ;;  %v4839_v14 = vld [vmem:[%s5358_s18 + $0x8] sm:$0xff]  ;;  %v4886_v37 = vld [vmem:[%s5358_s18 + $0x10] sm:$0xff]  ;;  %s6152_s9 = scalar_lea.vmem %s6189_s3, %s5269_s7 }
  0x11   : > { %v194_v9 = vrot.slane %v185_v8, %v5352_v7  ;;  %v187_v10 = vcombine.high %v185_v8, %v185_v8  ;;  %v1348_v15 = vrot.slane %v4839_v14, %v5352_v7  ;;  %v1341_v16 = vcombine.high %v4839_v14, %v4839_v14  ;;  %v182_v20 = vld [vmem:[%s5358_s18] sm:$0x3f] }
  0x12   : > { %v319_v22 = vrot.slane %v182_v20, %v5352_v7  ;;  %v312_v24 = vcombine.high %v182_v20, %v182_v20  ;;  %v5473_v41 = vrot.slane %v4886_v37, %v5352_v7  ;;  %v2474_v45 = vcombine.high %v4886_v37, %v4886_v37 }
  0x13   : > { %204 = vrot.lane.b32.xlu0 %v194_v9, %s5311_s19  ;;  %v202_v11 = vcombine.high %v194_v9, %v194_v9  ;;  %v201_v12 = vrot.slane %v187_v10, %v5352_v7  ;;  %v1356_v17 = vcombine.high %v1348_v15, %v1348_v15  ;;  %v5401_v18 = vrot.slane %v1341_v16, %v5352_v7 }
  0x14   : > { %v327_v26 = vcombine.high %v319_v22, %v319_v22  ;;  %v326_v31 = vrot.slane %v312_v24, %v5352_v7  ;;  %v332_v36 = vsel %vm220_vm2, %v319_v22, 0  ;;  %v5492_v50 = vcombine.high %v5473_v41, %v5473_v41 }
  0x15   : > { %208 = vrot.lane.b32.xlu1 %v201_v12, %s5311_s19  ;;  %v203_v13 = vcombine.high %v201_v12, %v201_v12  ;;  %v5406_v19 = vcombine.high %v5401_v18, %v5401_v18  ;;  %v5497_v53 = vrot.slane %v2474_v45, %v5352_v7 }
  0x16   : > { %v338_v39 = vsel %vm220_vm2, %v326_v31, 0 }
  0x17   : > { %206 = vrot.lane.b32.xlu0 %v202_v11, %s5311_s19  ;;  %v5505_v55 = vcombine.high %v5497_v53, %v5497_v53 }
  0x19   : > { %210 = vrot.lane.b32.xlu1 %v203_v13, %s5311_s19 }
  0x1b   : > { %442 = vrot.lane.b32.xlu0 %v194_v9, %s5312_s20 }
  0x1d   : > { %444 = vrot.lane.b32.xlu1 %v202_v11, %s5312_s20 }
  0x1f   : > { %446 = vrot.lane.b32.xlu0 %v201_v12, %s5312_s20 }
  0x21   : > { %448 = vrot.lane.b32.xlu1 %v203_v13, %s5312_s20 }
  0x23   : > { %571 = vrot.lane.b32.xlu0 %v194_v9, %s5313_s21 }
  0x25   : > { %573 = vrot.lane.b32.xlu1 %v202_v11, %s5313_s21 }
  0x27   : > { %575 = vrot.lane.b32.xlu0 %v201_v12, %s5313_s21 }
  0x29   : > { %577 = vrot.lane.b32.xlu1 %v203_v13, %s5313_s21 }
  0x2b   : > { %700 = vrot.lane.b32.xlu0 %v194_v9, %s5314_s22 }
  0x2d   : > { %702 = vrot.lane.b32.xlu1 %v202_v11, %s5314_s22 }
  0x2f   : > { %704 = vrot.lane.b32.xlu0 %v201_v12, %s5314_s22 }
  0x31   : > { %706 = vrot.lane.b32.xlu1 %v203_v13, %s5314_s22 }
  0x33   : > { %829 = vrot.lane.b32.xlu0 %v194_v9, %s5315_s23 }
  0x35   : > { %831 = vrot.lane.b32.xlu1 %v202_v11, %s5315_s23 }
  0x37   : > { %833 = vrot.lane.b32.xlu0 %v201_v12, %s5315_s23 }
  0x39   : > { %835 = vrot.lane.b32.xlu1 %v203_v13, %s5315_s23 }
  0x3b   : > { %958 = vrot.lane.b32.xlu0 %v194_v9, %s5316_s24 }
  0x3d   : > { %960 = vrot.lane.b32.xlu1 %v202_v11, %s5316_s24 }
  0x3f   : > { %962 = vrot.lane.b32.xlu0 %v201_v12, %s5316_s24 }
  0x41   : > { %964 = vrot.lane.b32.xlu1 %v203_v13, %s5316_s24 }
  0x43   : > { %1087 = vrot.lane.b32.xlu0 %v194_v9, %s5317_s25 }
  0x45   : > { %1089 = vrot.lane.b32.xlu1 %v202_v11, %s5317_s25 }
  0x47   : > { %1091 = vrot.lane.b32.xlu0 %v201_v12, %s5317_s25 }
  0x49   : > { %1093 = vrot.lane.b32.xlu1 %v203_v13, %s5317_s25 }
  0x4b   : > { %1216 = vrot.lane.b32.xlu0 %v194_v9, %s5318_s26  ;;  %v4813_v9 = vld [vmem:[%s6187_s1 + $0xc] sm:$0xf] }
  0x4d   : > { %1218 = vrot.lane.b32.xlu1 %v202_v11, %s5318_s26 }
  0x4f   : > { %1220 = vrot.lane.b32.xlu0 %v201_v12, %s5318_s26 }
  0x51   : > { %1222 = vrot.lane.b32.xlu1 %v203_v13, %s5318_s26 }
  0x53   : > { %1358 = vrot.lane.b32.xlu0 %v1348_v15, %s5311_s19 }
  0x55   : > { %1360 = vrot.lane.b32.xlu1 %v1356_v17, %s5311_s19 }
  0x57   : > { %1362 = vrot.lane.b32.xlu0 %v5401_v18, %s5311_s19 }
  0x59   : > { %1364 = vrot.lane.b32.xlu1 %v5406_v19, %s5311_s19 }
  0x5b   : > { %1592 = vrot.lane.b32.xlu0 %v1348_v15, %s5312_s20 }
  0x5d   : > { %1594 = vrot.lane.b32.xlu1 %v1356_v17, %s5312_s20 }
  0x5f   : > { %1596 = vrot.lane.b32.xlu0 %v5401_v18, %s5312_s20 }
  0x61   : > { %1598 = vrot.lane.b32.xlu1 %v5406_v19, %s5312_s20 }
  0x63   : > { %1719 = vrot.lane.b32.xlu0 %v1348_v15, %s5313_s21 }
  0x65   : > { %1721 = vrot.lane.b32.xlu1 %v1356_v17, %s5313_s21 }
  0x67   : > { %1723 = vrot.lane.b32.xlu0 %v5401_v18, %s5313_s21 }
  0x69   : > { %1725 = vrot.lane.b32.xlu1 %v5406_v19, %s5313_s21 }
  0x6b   : > { %1846 = vrot.lane.b32.xlu0 %v1348_v15, %s5314_s22 }
  0x6d   : > { %1848 = vrot.lane.b32.xlu1 %v1356_v17, %s5314_s22 }
  0x6f   : > { %1850 = vrot.lane.b32.xlu0 %v5401_v18, %s5314_s22 }
  0x71   : > { %1852 = vrot.lane.b32.xlu1 %v5406_v19, %s5314_s22 }
  0x73   : > { %1973 = vrot.lane.b32.xlu0 %v1348_v15, %s5315_s23 }
  0x75   : > { %1975 = vrot.lane.b32.xlu1 %v1356_v17, %s5315_s23 }
  0x77   : > { %1977 = vrot.lane.b32.xlu0 %v5401_v18, %s5315_s23 }
  0x79   : > { %1979 = vrot.lane.b32.xlu1 %v5406_v19, %s5315_s23 }
  0x7b   : > { %2100 = vrot.lane.b32.xlu0 %v1348_v15, %s5316_s24 }
  0x7d   : > { %2102 = vrot.lane.b32.xlu1 %v1356_v17, %s5316_s24 }
  0x7f   : > { %2104 = vrot.lane.b32.xlu0 %v5401_v18, %s5316_s24 }
  0x81   : > { %2106 = vrot.lane.b32.xlu1 %v5406_v19, %s5316_s24 }
  0x83   : > { %2227 = vrot.lane.b32.xlu0 %v1348_v15, %s5317_s25 }
  0x85   : > { %v205_v21 = vpop.permute.xlu0 %204  ;;  %2229 = vrot.lane.b32.xlu1 %v1356_v17, %s5317_s25 }
  0x87   : > { %v209_v23 = vpop.permute.xlu1 %208  ;;  %2231 = vrot.lane.b32.xlu0 %v5401_v18, %s5317_s25 }
  0x89   : > { %v207_v25 = vpop.permute.xlu0 %206  ;;  %2233 = vrot.lane.b32.xlu1 %v5406_v19, %s5317_s25 }
  0x8a   : > { %v214_v27 = vsel %vm212_vm1, %v207_v25, %v209_v23  ;;  %v213_v28 = vsel %vm212_vm1, %v205_v21, %v207_v25 }
  0x8b   : > { %4803 = vmatprep.subr.msk.bf16.mxu0 %vm220_vm2, %v214_v27  ;;  %v211_v29 = vpop.permute.xlu1 %210  ;;  %v222_v30 = vsel %vm220_vm2, %v213_v28, 0  ;;  %2354 = vrot.lane.b32.xlu0 %v1348_v15, %s5318_s26 }
  0x8c   : > { %231 = vmatpush1.bf16.msra.mxu0 %v222_v30  ;;  %v215_v32 = vsel %vm212_vm1, %v209_v23, %v211_v29  ;;  %v4821_v29 = vld [vmem:[%s6187_s1 + $0x14] sm:$0xf] }
  0x8d   : > { %v228_v34 = vsel %vm220_vm2, %v215_v32, 0  ;;  %v443_v35 = vpop.permute.xlu0 %442  ;;  %4806 = vmatprep.subr.msk.bf16.mxu0 %vm220_vm2, %v327_v26  ;;  %2356 = vrot.lane.b32.xlu1 %v1356_v17, %s5318_s26 }
  0x8e   : > { %5054 = vmatpush3.bf16.msra.mxu1 %v228_v34 }
  0x8f   : > { %4804 = vmatmul.mubr.msk.bf16.vlgmr.msra.gmra.mrb[0].mxu0 %vm216_vm3, %v4802_v33  ;;  %5059 = vmatprep.subr.bf16.mxu1 %v5308_v5  ;;  %v445_v38 = vpop.permute.xlu1 %444 }
  0x90   : > { %341 = vmatpush1.bf16.msra.mxu0 %v332_v36  ;;  %372 = vmatprep.mubr.bf16.mxu0 %v5309_v6  ;;  %v451_v42 = vsel %vm450_vm4, %v443_v35, %v445_v38 }
  0x91   : > { %5056 = vmatmul.mubr.msk.bf16.vlgmr.msra.gmra.mrb[0].mxu1 %vm216_vm3, %v4802_v33  ;;  %v447_v40 = vpop.permute.xlu0 %446  ;;  %2358 = vrot.lane.b32.xlu0 %v5401_v18, %s5318_s26  ;;  %v458_v49 = vsel %vm220_vm2, %v451_v42, 0 }
  0x92   : > { %5060 = vmatpush3.bf16.msra.mxu1 %v338_v39  ;;  %v452_v43 = vsel %vm450_vm4, %v445_v38, %v447_v40  ;;  %5061 = vmatprep.mubr.msk.bf16.mxu1 %vm5310_vm0, %v5308_v5  ;;  %v4825_v39 = vld [vmem:[%s6187_s1 + $0x18] sm:$0xf] }
  0x93   : > { %4810 = vmatprep.subr.msk.bf16.mxu0 %vm220_vm2, %v452_v43  ;;  %v449_v44 = vpop.permute.xlu1 %448  ;;  %5065 = vmatprep.subr.bf16.mxu1 %v5308_v5 }
  0x94   : > { %v453_v46 = vsel %vm450_vm4, %v447_v40, %v449_v44  ;;  %2360 = vrot.lane.b32.xlu1 %v5406_v19, %s5318_s26  ;;  %v4817_v19 = vld [vmem:[%s6187_s1 + $0x10] sm:$0xf] }
  0x95   : > { %v572_v48 = vpop.permute.xlu0 %571  ;;  %2491 = vrot.lane.b32.xlu0 %v5473_v41, %s5311_s19  ;;  %v464_v51 = vsel %vm220_vm2, %v453_v46, 0 }
  0x97   : > { %4807 = vmatmul.mubr.msk.bf16.vlgmr.msra.gmra.mrb[4].mxu0 %vm216_vm3, %v181_v47  ;;  %v574_v52 = vpop.permute.xlu1 %573 }
  0x98   : > { %467 = vmatpush1.bf16.msra.mxu0 %v458_v49  ;;  %498 = vmatprep.mubr.bf16.mxu0 %v5309_v6  ;;  %v580_v56 = vsel %vm579_vm5, %v572_v48, %v574_v52 }
  0x99   : > { %5062 = vmatmul.mubr.msk.bf16.vlgmr.msra.gmra.mrb[4].mxu1 %vm216_vm3, %v181_v47  ;;  %v576_v54 = vpop.permute.xlu0 %575  ;;  %2493 = vrot.lane.b32.xlu1 %v5492_v50, %s5311_s19  ;;  %v587_v62 = vsel %vm220_vm2, %v580_v56, 0 }
  0x9a   : > { %5066 = vmatpush3.bf16.msra.mxu1 %v464_v51  ;;  %v581_v57 = vsel %vm579_vm5, %v574_v52, %v576_v54  ;;  %5067 = vmatprep.mubr.msk.bf16.mxu1 %vm5310_vm0, %v5308_v5  ;;  %v4829_v51 = vld [vmem:[%s6187_s1 + $0x1c] sm:$0xf] }
  0x9b   : > { %4814 = vmatprep.subr.msk.bf16.mxu0 %vm220_vm2, %v581_v57  ;;  %v578_v58 = vpop.permute.xlu1 %577  ;;  %5071 = vmatprep.subr.bf16.mxu1 %v5308_v5 }
  0x9c   : > { %v582_v59 = vsel %vm579_vm5, %v576_v54, %v578_v58  ;;  %2495 = vrot.lane.b32.xlu0 %v5497_v53, %s5311_s19  ;;  %v4837_v58 = vld [vmem:[%s5358_s18 + $0x8] sm:$0x3f] }
  0x9d   : > { %v701_v61 = vpop.permute.xlu0 %700  ;;  %2497 = vrot.lane.b32.xlu1 %v5505_v55, %s5311_s19  ;;  %v593_v63 = vsel %vm220_vm2, %v582_v59, 0 }
  0x9f   : > { %4811 = vmatmul.mubr.msk.bf16.vlgmr.msra.gmra.mrb[8].mxu0 %vm216_vm3, %v4809_v60  ;;  %v703_v0 = vpop.permute.xlu1 %702 }
  0xa0   : > { %596 = vmatpush1.bf16.msra.mxu0 %v587_v62  ;;  %627 = vmatprep.mubr.bf16.mxu0 %v5309_v6  ;;  %v709_v2 = vsel %vm708_vm6, %v701_v61, %v703_v0 }
  0xa1   : > { %5068 = vmatmul.mubr.msk.bf16.vlgmr.msra.gmra.mrb[8].mxu1 %vm216_vm3, %v4809_v60  ;;  %v705_v1 = vpop.permute.xlu0 %704  ;;  %2725 = vrot.lane.b32.xlu0 %v5473_v41, %s5312_s20  ;;  %v716_v11 = vsel %vm220_vm2, %v709_v2, 0 }
  0xa2   : > { %5072 = vmatpush3.bf16.msra.mxu1 %v593_v63  ;;  %v710_v3 = vsel %vm708_vm6, %v703_v0, %v705_v1  ;;  %5073 = vmatprep.mubr.msk.bf16.mxu1 %vm5310_vm0, %v5308_v5  ;;  %v1470_v63 = vrot.slane %v4837_v58, %v5352_v7 }
  0xa3   : > { %4818 = vmatprep.subr.msk.bf16.mxu0 %vm220_vm2, %v710_v3  ;;  %v707_v4 = vpop.permute.xlu1 %706  ;;  %5077 = vmatprep.subr.bf16.mxu1 %v5308_v5 }
  0xa4   : > { %v711_v8 = vsel %vm708_vm6, %v705_v1, %v707_v4  ;;  %2727 = vrot.lane.b32.xlu1 %v5492_v50, %s5312_s20  ;;  %v4833_v1 = vld [vmem:[%s6187_s1 + $0x20] sm:$0xf] }
  0xa5   : > { %v830_v10 = vpop.permute.xlu0 %829  ;;  %2729 = vrot.lane.b32.xlu0 %v5497_v53, %s5312_s20  ;;  %v722_v12 = vsel %vm220_vm2, %v711_v8, 0  ;;  %v1478_v8 = vcombine.high %v1470_v63, %v1470_v63 }
  0xa7   : > { %4815 = vmatmul.mubr.msk.bf16.vlgmr.msra.gmra.mrb[12].mxu0 %vm216_vm3, %v4813_v9  ;;  %v832_v13 = vpop.permute.xlu1 %831 }
  0xa8   : > { %725 = vmatpush1.bf16.msra.mxu0 %v716_v11  ;;  %756 = vmatprep.mubr.bf16.mxu0 %v5309_v6  ;;  %v838_v15 = vsel %vm837_vm7, %v830_v10, %v832_v13  ;;  %v1463_v10 = vcombine.high %v4837_v58, %v4837_v58 }
  0xa9   : > { %5074 = vmatmul.mubr.msk.bf16.vlgmr.msra.gmra.mrb[12].mxu1 %vm216_vm3, %v4813_v9  ;;  %v834_v14 = vpop.permute.xlu0 %833  ;;  %2731 = vrot.lane.b32.xlu1 %v5505_v55, %s5312_s20  ;;  %v845_v21 = vsel %vm220_vm2, %v838_v15, 0  ;;  %v1483_v15 = vsel %vm220_vm2, %v1470_v63, 0 }
  0xaa   : > { %5078 = vmatpush3.bf16.msra.mxu1 %v722_v12  ;;  %v839_v16 = vsel %vm837_vm7, %v832_v13, %v834_v14  ;;  %5079 = vmatprep.mubr.msk.bf16.mxu1 %vm5310_vm0, %v5308_v5  ;;  %v1477_v12 = vrot.slane %v1463_v10, %v5352_v7 }
  0xab   : > { %4822 = vmatprep.subr.msk.bf16.mxu0 %vm220_vm2, %v839_v16  ;;  %v836_v17 = vpop.permute.xlu1 %835  ;;  %5083 = vmatprep.subr.bf16.mxu1 %v5308_v5 }
  0xac   : > { %v840_v18 = vsel %vm837_vm7, %v834_v14, %v836_v17  ;;  %2852 = vrot.lane.b32.xlu0 %v5473_v41, %s5313_s21  ;;  %v4838_v14 = vld [vmem:[%s6187_s1 + $0x4] sm:$0xf] }
  0xad   : > { %v959_v20 = vpop.permute.xlu0 %958  ;;  %2854 = vrot.lane.b32.xlu1 %v5492_v50, %s5313_s21  ;;  %v851_v22 = vsel %vm220_vm2, %v840_v18, 0  ;;  %v1489_v18 = vsel %vm220_vm2, %v1477_v12, 0 }
  0xaf   : > { %4819 = vmatmul.mubr.msk.bf16.vlgmr.msra.gmra.mrb[16].mxu0 %vm216_vm3, %v4817_v19  ;;  %v961_v23 = vpop.permute.xlu1 %960 }
  0xb0   : > { %854 = vmatpush1.bf16.msra.mxu0 %v845_v21  ;;  %885 = vmatprep.mubr.bf16.mxu0 %v5309_v6  ;;  %v967_v25 = vsel %vm966_vm8, %v959_v20, %v961_v23  ;;  %v4933_v21 = vld [vmem:[%s5358_s18 + $0x18] sm:$0xff] }
  0xb1   : > { %5080 = vmatmul.mubr.msk.bf16.vlgmr.msra.gmra.mrb[16].mxu1 %vm216_vm3, %v4817_v19  ;;  %v963_v24 = vpop.permute.xlu0 %962  ;;  %2856 = vrot.lane.b32.xlu0 %v5497_v53, %s5313_s21  ;;  %v974_v31 = vsel %vm220_vm2, %v967_v25, 0  ;;  %v3607_v25 = vcombine.high %v4933_v21, %v4933_v21 }
  0xb2   : > { %5084 = vmatpush3.bf16.msra.mxu1 %v851_v22  ;;  %v968_v26 = vsel %vm966_vm8, %v961_v23, %v963_v24  ;;  %5085 = vmatprep.mubr.msk.bf16.mxu1 %vm5310_vm0, %v5308_v5 }
  0xb3   : > { %4826 = vmatprep.subr.msk.bf16.mxu0 %vm220_vm2, %v968_v26  ;;  %v965_v27 = vpop.permute.xlu1 %964  ;;  %5089 = vmatprep.subr.bf16.mxu1 %v5308_v5  ;;  %v5697_v26 = vrot.slane %v4933_v21, %v5352_v7 }
  0xb4   : > { %v969_v28 = vsel %vm966_vm8, %v963_v24, %v965_v27  ;;  %2858 = vrot.lane.b32.xlu1 %v5505_v55, %s5313_s21  ;;  %v1335_v24 = vld [vmem:[%s6187_s1] sm:$0xf] }
  0xb5   : > { %v1088_v30 = vpop.permute.xlu0 %1087  ;;  %2979 = vrot.lane.b32.xlu0 %v5473_v41, %s5314_s22  ;;  %v980_v32 = vsel %vm220_vm2, %v969_v28, 0 }
  0xb7   : > { %4823 = vmatmul.mubr.msk.bf16.vlgmr.msra.gmra.mrb[20].mxu0 %vm216_vm3, %v4821_v29  ;;  %v1090_v33 = vpop.permute.xlu1 %1089 }
  0xb8   : > { %983 = vmatpush1.bf16.msra.mxu0 %v974_v31  ;;  %1014 = vmatprep.mubr.bf16.mxu0 %v5309_v6  ;;  %v1096_v35 = vsel %vm1095_vm9, %v1088_v30, %v1090_v33  ;;  %v5707_v30 = vcombine.high %v5697_v26, %v5697_v26  ;;  %v5712_v31 = vrot.slane %v3607_v25, %v5352_v7 }
  0xb9   : > { %5086 = vmatmul.mubr.msk.bf16.vlgmr.msra.gmra.mrb[20].mxu1 %vm216_vm3, %v4821_v29  ;;  %v1092_v34 = vpop.permute.xlu0 %1091  ;;  %2981 = vrot.lane.b32.xlu1 %v5492_v50, %s5314_s22  ;;  %v1103_v42 = vsel %vm220_vm2, %v1096_v35, 0 }
  0xba   : > { %5090 = vmatpush3.bf16.msra.mxu1 %v980_v32  ;;  %v1097_v36 = vsel %vm1095_vm9, %v1090_v33, %v1092_v34  ;;  %5091 = vmatprep.mubr.msk.bf16.mxu1 %vm5310_vm0, %v5308_v5  ;;  %v5724_v33 = vcombine.high %v5712_v31, %v5712_v31 }
  0xbb   : > { %4830 = vmatprep.subr.msk.bf16.mxu0 %vm220_vm2, %v1097_v36  ;;  %v1094_v37 = vpop.permute.xlu1 %1093  ;;  %5095 = vmatprep.subr.bf16.mxu1 %v5308_v5  ;;  %v4846_v36 = vld [vmem:[%s6187_s1 + $0x8] sm:$0xf] }
  0xbc   : > { %v1098_v38 = vsel %vm1095_vm9, %v1092_v34, %v1094_v37  ;;  %2983 = vrot.lane.b32.xlu0 %v5497_v53, %s5314_s22 }
  0xbd   : > { %v1217_v40 = vpop.permute.xlu0 %1216  ;;  %2985 = vrot.lane.b32.xlu1 %v5505_v55, %s5314_s22  ;;  %v1109_v43 = vsel %vm220_vm2, %v1098_v38, 0 }
  0xbf   : > { %4827 = vmatmul.mubr.msk.bf16.vlgmr.msra.gmra.mrb[24].mxu0 %vm216_vm3, %v4825_v39  ;;  %v1219_v44 = vpop.permute.xlu1 %1218 }
  0xc0   : > { %1112 = vmatpush1.bf16.msra.mxu0 %v1103_v42  ;;  %3106 = vrot.lane.b32.xlu0 %v5473_v41, %s5315_s23  ;;  %v1225_v46 = vsel %vm1224_vm10, %v1217_v40, %v1219_v44 }
  0xc1   : > { %5092 = vmatmul.mubr.msk.bf16.vlgmr.msra.gmra.mrb[24].mxu1 %vm216_vm3, %v4825_v39  ;;  %v1221_v45 = vpop.permute.xlu0 %1220  ;;  %1143 = vmatprep.mubr.bf16.mxu0 %v5309_v6  ;;  %v1232_v54 = vsel %vm220_vm2, %v1225_v46, 0 }
  0xc2   : > { %5096 = vmatpush3.bf16.msra.mxu1 %v1109_v43  ;;  %v1226_v47 = vsel %vm1224_vm10, %v1219_v44, %v1221_v45  ;;  %3108 = vrot.lane.b32.xlu1 %v5492_v50, %s5315_s23 }
  0xc3   : > { %4834 = vmatprep.subr.msk.bf16.mxu0 %vm220_vm2, %v1226_v47  ;;  %v1223_v48 = vpop.permute.xlu1 %1222  ;;  %5097 = vmatprep.mubr.msk.bf16.mxu1 %vm5310_vm0, %v5308_v5  ;;  %v4851_v47 = vld [vmem:[%s6187_s1 + $0xc] sm:$0xf] }
  0xc4   : > { %v1227_v49 = vsel %vm1224_vm10, %v1221_v45, %v1223_v48  ;;  %5101 = vmatprep.subr.bf16.mxu1 %v5308_v5  ;;  %3110 = vrot.lane.b32.xlu0 %v5497_v53, %s5315_s23 }
  0xc5   : > { %v1359_v52 = vpop.permute.xlu0 %1358  ;;  %v1238_v56 = vsel %vm220_vm2, %v1227_v49, 0 }
  0xc6   : > { %3112 = vrot.lane.b32.xlu1 %v5505_v55, %s5315_s23 }
  0xc7   : > { %4831 = vmatmul.mubr.msk.bf16.vlgmr.msra.gmra.mrb[28].mxu0 %vm216_vm3, %v4829_v51  ;;  %v1361_v57 = vpop.permute.xlu1 %1360 }
  0xc8   : > { %1241 = vmatpush1.bf16.msra.mxu0 %v1232_v54  ;;  %3233 = vrot.lane.b32.xlu0 %v5473_v41, %s5316_s24  ;;  %v1366_v60 = vsel %vm212_vm1, %v1359_v52, %v1361_v57 }
  0xc9   : > { %5098 = vmatmul.mubr.msk.bf16.vlgmr.msra.gmra.mrb[28].mxu1 %vm216_vm3, %v4829_v51  ;;  %v1363_v59 = vpop.permute.xlu0 %1362  ;;  %1272 = vmatprep.mubr.bf16.mxu0 %v5309_v6  ;;  %v1373_v2 = vsel %vm220_vm2, %v1366_v60, 0  ;;  %v4856_v60 = vld [vmem:[%s6187_s1 + $0x10] sm:$0xf] }
  0xca   : > { %5102 = vmatpush3.bf16.msra.mxu1 %v1238_v56  ;;  %v1367_v61 = vsel %vm212_vm1, %v1361_v57, %v1363_v59  ;;  %3235 = vrot.lane.b32.xlu1 %v5492_v50, %s5316_s24 }
  0xcb   : > { %4840 = vmatprep.subr.msk.bf16.mxu0 %vm220_vm2, %v1367_v61  ;;  %v1365_v62 = vpop.permute.xlu1 %1364  ;;  %5103 = vmatprep.mubr.msk.bf16.mxu1 %vm5310_vm0, %v5308_v5 }
  0xcc   : > { %v1368_v0 = vsel %vm212_vm1, %v1363_v59, %v1365_v62  ;;  %5107 = vmatprep.subr.bf16.mxu1 %v5308_v5  ;;  %3237 = vrot.lane.b32.xlu0 %v5497_v53, %s5316_s24 }
  0xcd   : > { %v1593_v3 = vpop.permute.xlu0 %1592  ;;  %v1379_v4 = vsel %vm220_vm2, %v1368_v0, 0 }
  0xce   : > { %3239 = vrot.lane.b32.xlu1 %v5505_v55, %s5316_s24 }
  0xcf   : > { %4835 = vmatmul.mubr.msk.bf16.vlgmr.msra.gmra.mrb[32].mxu0 %vm216_vm3, %v4833_v1  ;;  %v1595_v9 = vpop.permute.xlu1 %1594 }
  0xd0   : > { %1382 = vmatpush1.bf16.msra.mxu0 %v1373_v2  ;;  %3360 = vrot.lane.b32.xlu0 %v5473_v41, %s5317_s25  ;;  %v1600_v22 = vsel %vm450_vm4, %v1593_v3, %v1595_v9 }
  0xd1   : > { %5104 = vmatmul.mubr.msk.bf16.vlgmr.msra.gmra.mrb[32].mxu1 %vm216_vm3, %v4833_v1  ;;  %1413 = vmatprep.mubr.bf16.mxu0 %v5309_v6  ;;  %v1597_v11 = vpop.permute.xlu0 %1596 }
  0xd2   : > { %5108 = vmatpush3.bf16.msra.mxu1 %v1379_v4  ;;  %3362 = vrot.lane.b32.xlu1 %v5492_v50, %s5317_s25  ;;  %v1601_v17 = vsel %vm450_vm4, %v1595_v9, %v1597_v11  ;;  %v4861_v9 = vld [vmem:[%s6187_s1 + $0x14] sm:$0xf] }
  0xd3   : > { %5109 = vmatprep.mubr.msk.bf16.mxu1 %vm5310_vm0, %v5308_v5  ;;  %4843 = vmatprep.subr.msk.bf16.mxu0 %vm220_vm2, %v1478_v8  ;;  %v1599_v13 = vpop.permute.xlu1 %1598 }
  0xd4   : > { %3364 = vrot.lane.b32.xlu0 %v5497_v53, %s5317_s25  ;;  %5113 = vmatprep.subr.bf16.mxu1 %v5308_v5 }
  0xd5   : > { %v1720_v16 = vpop.permute.xlu0 %1719 }
  0xd6   : > { %3366 = vrot.lane.b32.xlu1 %v5505_v55, %s5317_s25 }
  0xd7   : > { %4841 = vmatmul.mubr.msk.bf16.vlgmr.msra.gmra.mrb[36].mxu0 %vm216_vm3, %v4838_v14  ;;  %v1722_v19 = vpop.permute.xlu1 %1721 }
  0xd8   : > { %1492 = vmatpush1.bf16.msra.mxu0 %v1483_v15  ;;  %3487 = vrot.lane.b32.xlu0 %v5473_v41, %s5318_s26  ;;  %v1602_v41 = vsel %vm450_vm4, %v1597_v11, %v1599_v13 }
  0xd9   : > { %5110 = vmatmul.mubr.msk.bf16.vlgmr.msra.gmra.mrb[36].mxu1 %vm216_vm3, %v4838_v14  ;;  %4848 = vmatprep.subr.msk.bf16.mxu0 %vm220_vm2, %v1601_v17  ;;  %v1724_v20 = vpop.permute.xlu0 %1723  ;;  %v1613_v29 = vsel %vm220_vm2, %v1602_v41, 0 }
  0xda   : > { %5114 = vmatpush3.bf16.msra.mxu1 %v1489_v18  ;;  %1523 = vmatprep.mubr.bf16.mxu0 %v5309_v6  ;;  %v1728_v28 = vsel %vm579_vm5, %v1722_v19, %v1724_v20  ;;  %v4866_v18 = vld [vmem:[%s6187_s1 + $0x18] sm:$0xf] }
  0xdb   : > { %3489 = vrot.lane.b32.xlu1 %v5492_v50, %s5318_s26  ;;  %5115 = vmatprep.mubr.msk.bf16.mxu1 %vm5310_vm0, %v5308_v5  ;;  %v1726_v23 = vpop.permute.xlu1 %1725  ;;  %v1607_v50 = vsel %vm220_vm2, %v1600_v22, 0 }
  0xdc   : > { %5119 = vmatprep.subr.bf16.mxu1 %v5308_v5  ;;  %3491 = vrot.lane.b32.xlu0 %v5497_v53, %s5318_s26  ;;  %v1729_v35 = vsel %vm579_vm5, %v1724_v20, %v1726_v23 }
  0xdd   : > { %v1847_v27 = vpop.permute.xlu0 %1846  ;;  %v1740_v40 = vsel %vm220_vm2, %v1729_v35, 0 }
  0xdf   : > { %4844 = vmatmul.mubr.msk.bf16.vlgmr.msra.gmra.mrb[40].mxu0 %vm216_vm3, %v1335_v24  ;;  %3493 = vrot.lane.b32.xlu1 %v5505_v55, %s5318_s26  ;;  %v1849_v53 = vpop.permute.xlu1 %1848  ;;  %v1727_v55 = vsel %vm579_vm5, %v1720_v16, %v1722_v19 }
  0xe0   : > { %1616 = vmatpush1.bf16.msra.mxu0 %v1607_v50  ;;  %3624 = vrot.lane.b32.xlu0 %v5697_v26, %s5311_s19  ;;  %v1734_v37 = vsel %vm220_vm2, %v1727_v55, 0  ;;  %v1854_v44 = vsel %vm708_vm6, %v1847_v27, %v1849_v53  ;;  %v4871_v50 = vld [vmem:[%s6187_s1 + $0x1c] sm:$0xf] }
  0xe1   : > { %5116 = vmatmul.mubr.msk.bf16.vlgmr.msra.gmra.mrb[40].mxu1 %vm216_vm3, %v1335_v24  ;;  %4853 = vmatprep.subr.msk.bf16.mxu0 %vm220_vm2, %v1728_v28  ;;  %v1851_v32 = vpop.permute.xlu0 %1850  ;;  %v1861_v48 = vsel %vm220_vm2, %v1854_v44, 0 }
  0xe2   : > { %5120 = vmatpush3.bf16.msra.mxu1 %v1613_v29  ;;  %1647 = vmatprep.mubr.bf16.mxu0 %v5309_v6  ;;  %v1855_v39 = vsel %vm708_vm6, %v1849_v53, %v1851_v32 }
  0xe3   : > { %3626 = vrot.lane.b32.xlu1 %v5707_v30, %s5311_s19  ;;  %5121 = vmatprep.mubr.msk.bf16.mxu1 %vm5310_vm0, %v5308_v5  ;;  %v1853_v34 = vpop.permute.xlu1 %1852 }
  0xe4   : > { %5125 = vmatprep.subr.bf16.mxu1 %v5308_v5  ;;  %3628 = vrot.lane.b32.xlu0 %v5712_v31, %s5311_s19  ;;  %v1856_v46 = vsel %vm708_vm6, %v1851_v32, %v1853_v34  ;;  %v4884_v32 = vld [vmem:[%s5358_s18 + $0x10] sm:$0x3f] }
  0xe5   : > { %v1974_v38 = vpop.permute.xlu0 %1973  ;;  %v1867_v52 = vsel %vm220_vm2, %v1856_v46, 0  ;;  %v2596_v44 = vcombine.high %v4884_v32, %v4884_v32 }
  0xe7   : > { %4849 = vmatmul.mubr.msk.bf16.vlgmr.msra.gmra.mrb[44].mxu0 %vm216_vm3, %v4846_v36  ;;  %3630 = vrot.lane.b32.xlu1 %v5724_v33, %s5311_s19  ;;  %v1976_v42 = vpop.permute.xlu1 %1975  ;;  %v2610_v46 = vrot.slane %v2596_v44, %v5352_v7 }
  0xe8   : > { %1743 = vmatpush1.bf16.msra.mxu0 %v1734_v37  ;;  %3858 = vrot.lane.b32.xlu0 %v5697_v26, %s5312_s20  ;;  %v1981_v57 = vsel %vm837_vm7, %v1974_v38, %v1976_v42  ;;  %v4876_v38 = vld [vmem:[%s6187_s1 + $0x20] sm:$0xf] }
  0xe9   : > { %5122 = vmatmul.mubr.msk.bf16.vlgmr.msra.gmra.mrb[44].mxu1 %vm216_vm3, %v4846_v36  ;;  %4858 = vmatprep.subr.msk.bf16.mxu0 %vm220_vm2, %v1855_v39  ;;  %v1978_v43 = vpop.permute.xlu0 %1977  ;;  %v1988_v61 = vsel %vm220_vm2, %v1981_v57, 0  ;;  %v2603_v36 = vrot.slane %v4884_v32, %v5352_v7 }
  0xea   : > { %5126 = vmatpush3.bf16.msra.mxu1 %v1740_v40  ;;  %1774 = vmatprep.mubr.bf16.mxu0 %v5309_v6  ;;  %v1982_v51 = vsel %vm837_vm7, %v1976_v42, %v1978_v43 }
  0xeb   : > { %5127 = vmatprep.mubr.msk.bf16.mxu1 %vm5310_vm0, %v5308_v5  ;;  %5131 = vmatprep.subr.bf16.mxu1 %v5308_v5  ;;  %v1980_v45 = vpop.permute.xlu1 %1979 }
  0xec   : > { %3862 = vrot.lane.b32.xlu0 %v5712_v31, %s5312_s20  ;;  %3860 = vrot.lane.b32.xlu1 %v5707_v30, %s5312_s20  ;;  %v1983_v59 = vsel %vm837_vm7, %v1978_v43, %v1980_v45  ;;  %v2611_v43 = vcombine.high %v2603_v36, %v2603_v36 }
  0xed   : > { %v2101_v49 = vpop.permute.xlu0 %2100  ;;  %v1994_v0 = vsel %vm220_vm2, %v1983_v59, 0  ;;  %v2468_v59 = vld [vmem:[%s6187_s1] sm:$0xf] }
  0xef   : > { %4854 = vmatmul.mubr.msk.bf16.vlgmr.msra.gmra.mrb[48].mxu0 %vm216_vm3, %v4851_v47  ;;  %v2103_v54 = vpop.permute.xlu1 %2102 }
  0xf0   : > { %1870 = vmatpush1.bf16.msra.mxu0 %v1861_v48  ;;  %3985 = vrot.lane.b32.xlu0 %v5697_v26, %s5313_s21  ;;  %v2108_v3 = vsel %vm966_vm8, %v2101_v49, %v2103_v54  ;;  %v2616_v48 = vsel %vm220_vm2, %v2603_v36, 0  ;;  %v180_v49 = vld [vmem:[%s6188_s2] sm:$0xff] }
  0xf1   : > { %5128 = vmatmul.mubr.msk.bf16.vlgmr.msra.gmra.mrb[48].mxu1 %vm216_vm3, %v4851_v47  ;;  %4863 = vmatprep.subr.msk.bf16.mxu0 %vm220_vm2, %v1982_v51  ;;  %v2105_v56 = vpop.permute.xlu0 %2104  ;;  %v2115_v10 = vsel %vm220_vm2, %v2108_v3, 0 }
  0xf2   : > { %5132 = vmatpush3.bf16.msra.mxu1 %v1867_v52  ;;  %1901 = vmatprep.mubr.bf16.mxu0 %v5309_v6  ;;  %v2109_v63 = vsel %vm966_vm8, %v2103_v54, %v2105_v56  ;;  %v2622_v54 = vsel %vm220_vm2, %v2610_v46, 0 }
  0xf3   : > { %5133 = vmatprep.mubr.msk.bf16.mxu1 %vm5310_vm0, %v5308_v5  ;;  %5137 = vmatprep.subr.bf16.mxu1 %v5308_v5  ;;  %v2107_v58 = vpop.permute.xlu1 %2106 }
  0xf4   : > { %3989 = vrot.lane.b32.xlu0 %v5712_v31, %s5313_s21  ;;  %3864 = vrot.lane.b32.xlu1 %v5724_v33, %s5312_s20  ;;  %v2110_v8 = vsel %vm966_vm8, %v2105_v56, %v2107_v58 }
  0xf5   : > { %v2228_v62 = vpop.permute.xlu0 %2227  ;;  %v2121_v13 = vsel %vm220_vm2, %v2110_v8, 0 }
  0xf7   : > { %4859 = vmatmul.mubr.msk.bf16.vlgmr.msra.gmra.mrb[52].mxu0 %vm216_vm3, %v4856_v60  ;;  %v2230_v1 = vpop.permute.xlu1 %2229 }
  0xf8   : > { %1997 = vmatpush1.bf16.msra.mxu0 %v1988_v61  ;;  %4112 = vrot.lane.b32.xlu0 %v5697_v26, %s5314_s22  ;;  %v2235_v15 = vsel %vm1095_vm9, %v2228_v62, %v2230_v1 }
  0xf9   : > { %5134 = vmatmul.mubr.msk.bf16.vlgmr.msra.gmra.mrb[52].mxu1 %vm216_vm3, %v4856_v60  ;;  %4868 = vmatprep.subr.msk.bf16.mxu0 %vm220_vm2, %v2109_v63  ;;  %v2232_v2 = vpop.permute.xlu0 %2231  ;;  %v2242_v19 = vsel %vm220_vm2, %v2235_v15, 0 }
  0xfa   : > { %5138 = vmatpush3.bf16.msra.mxu1 %v1994_v0  ;;  %2028 = vmatprep.mubr.bf16.mxu0 %v5309_v6  ;;  %v2236_v12 = vsel %vm1095_vm9, %v2230_v1, %v2232_v2 }
  0xfb   : > { %3987 = vrot.lane.b32.xlu1 %v5707_v30, %s5313_s21  ;;  %5139 = vmatprep.mubr.msk.bf16.mxu1 %vm5310_vm0, %v5308_v5  ;;  %v2234_v4 = vpop.permute.xlu1 %2233 }
  0xfc   : > { %5143 = vmatprep.subr.bf16.mxu1 %v5308_v5  ;;  %4116 = vrot.lane.b32.xlu0 %v5712_v31, %s5314_s22  ;;  %v2237_v17 = vsel %vm1095_vm9, %v2232_v2, %v2234_v4 }
  0xfd   : > { %v2355_v11 = vpop.permute.xlu0 %2354  ;;  %v2248_v22 = vsel %vm220_vm2, %v2237_v17, 0 }
  0xff   : > { %4864 = vmatmul.mubr.msk.bf16.vlgmr.msra.gmra.mrb[56].mxu0 %vm216_vm3, %v4861_v9  ;;  %3991 = vrot.lane.b32.xlu1 %v5724_v33, %s5313_s21  ;;  %v2357_v14 = vpop.permute.xlu1 %2356 }
 0x100   : > { %2124 = vmatpush1.bf16.msra.mxu0 %v2115_v10  ;;  %4239 = vrot.lane.b32.xlu0 %v5697_v26, %s5315_s23  ;;  %v2362_v41 = vsel %vm1224_vm10, %v2355_v11, %v2357_v14 }
 0x101   : > { %5140 = vmatmul.mubr.msk.bf16.vlgmr.msra.gmra.mrb[56].mxu1 %vm216_vm3, %v4861_v9  ;;  %4873 = vmatprep.subr.msk.bf16.mxu0 %vm220_vm2, %v2236_v12  ;;  %v2369_v27 = vsel %vm220_vm2, %v2362_v41, 0  ;;  %v4903_v41 = vld [vmem:[%s6187_s1 + $0x10] sm:$0xf] }
 0x102   : > { %5144 = vmatpush3.bf16.msra.mxu1 %v2121_v13  ;;  %2155 = vmatprep.mubr.bf16.mxu0 %v5309_v6 }
 0x103   : > { %4114 = vrot.lane.b32.xlu1 %v5707_v30, %s5314_s22  ;;  %5145 = vmatprep.mubr.msk.bf16.mxu1 %vm5310_vm0, %v5308_v5  ;;  %v2359_v16 = vpop.permute.xlu0 %2358 }
 0x104   : > { %5149 = vmatprep.subr.bf16.mxu1 %v5308_v5  ;;  %4243 = vrot.lane.b32.xlu0 %v5712_v31, %s5315_s23  ;;  %v2363_v20 = vsel %vm1224_vm10, %v2357_v14, %v2359_v16  ;;  %v4898_v14 = vld [vmem:[%s6187_s1 + $0xc] sm:$0xf] }
 0x106   : > { %v2361_v21 = vpop.permute.xlu1 %2360 }
 0x107   : > { %4869 = vmatmul.mubr.msk.bf16.vlgmr.msra.gmra.mrb[60].mxu0 %vm216_vm3, %v4866_v18  ;;  %4118 = vrot.lane.b32.xlu1 %v5724_v33, %s5314_s22  ;;  %v2492_v23 = vpop.permute.xlu0 %2491  ;;  %v2364_v25 = vsel %vm1224_vm10, %v2359_v16, %v2361_v21 }
 0x108   : > { %2251 = vmatpush1.bf16.msra.mxu0 %v2242_v19  ;;  %4366 = vrot.lane.b32.xlu0 %v5697_v26, %s5316_s24  ;;  %v2375_v29 = vsel %vm220_vm2, %v2364_v25, 0 }
 0x109   : > { %5146 = vmatmul.mubr.msk.bf16.vlgmr.msra.gmra.mrb[60].mxu1 %vm216_vm3, %v4866_v18  ;;  %4878 = vmatprep.subr.msk.bf16.mxu0 %vm220_vm2, %v2363_v20 }
 0x10a   : > { %5150 = vmatpush3.bf16.msra.mxu1 %v2248_v22  ;;  %2282 = vmatprep.mubr.bf16.mxu0 %v5309_v6 }
 0x10b   : > { %4241 = vrot.lane.b32.xlu1 %v5707_v30, %s5315_s23  ;;  %5151 = vmatprep.mubr.msk.bf16.mxu1 %vm5310_vm0, %v5308_v5  ;;  %v2494_v24 = vpop.permute.xlu1 %2493 }
 0x10c   : > { %5155 = vmatprep.subr.bf16.mxu1 %v5308_v5  ;;  %4370 = vrot.lane.b32.xlu0 %v5712_v31, %s5316_s24  ;;  %v2499_v34 = vsel %vm212_vm1, %v2492_v23, %v2494_v24 }
 0x10d   : > { %v2506_v39 = vsel %vm220_vm2, %v2499_v34, 0  ;;  %v4908_v34 = vld [vmem:[%s6187_s1 + $0x14] sm:$0xf] }
 0x10e   : > { %v2496_v28 = vpop.permute.xlu0 %2495 }
 0x10f   : > { %4874 = vmatmul.mubr.msk.bf16.vlgmr.msra.gmra.mrb[64].mxu0 %vm216_vm3, %v4871_v50  ;;  %v2500_v53 = vsel %vm212_vm1, %v2494_v24, %v2496_v28  ;;  %4245 = vrot.lane.b32.xlu1 %v5724_v33, %s5315_s23  ;;  %v2498_v55 = vpop.permute.xlu1 %2497 }
 0x110   : > { %2378 = vmatpush1.bf16.msra.mxu0 %v2369_v27  ;;  %4493 = vrot.lane.b32.xlu0 %v5697_v26, %s5317_s25  ;;  %v2501_v37 = vsel %vm212_vm1, %v2496_v28, %v2498_v55 }
 0x111   : > { %5152 = vmatmul.mubr.msk.bf16.vlgmr.msra.gmra.mrb[64].mxu1 %vm216_vm3, %v4871_v50  ;;  %4887 = vmatprep.subr.msk.bf16.mxu0 %vm220_vm2, %v2500_v53  ;;  %v2512_v42 = vsel %vm220_vm2, %v2501_v37, 0 }
 0x112   : > { %5156 = vmatpush3.bf16.msra.mxu1 %v2375_v29  ;;  %2409 = vmatprep.mubr.bf16.mxu0 %v5309_v6 }
 0x113   : > { %4368 = vrot.lane.b32.xlu1 %v5707_v30, %s5316_s24  ;;  %5157 = vmatprep.mubr.msk.bf16.mxu1 %vm5310_vm0, %v5308_v5  ;;  %v2726_v35 = vpop.permute.xlu0 %2725 }
 0x114   : > { %5161 = vmatprep.subr.bf16.mxu1 %v5308_v5  ;;  %4497 = vrot.lane.b32.xlu0 %v5712_v31, %s5317_s25 }
 0x116   : > { %v2728_v40 = vpop.permute.xlu1 %2727 }
 0x117   : > { %4879 = vmatmul.mubr.msk.bf16.vlgmr.msra.gmra.mrb[68].mxu0 %vm216_vm3, %v4876_v38  ;;  %4372 = vrot.lane.b32.xlu1 %v5724_v33, %s5316_s24  ;;  %v2730_v45 = vpop.permute.xlu0 %2729  ;;  %v2733_v56 = vsel %vm450_vm4, %v2726_v35, %v2728_v40 }
 0x118   : > { %2515 = vmatpush1.bf16.msra.mxu0 %v2506_v39  ;;  %4620 = vrot.lane.b32.xlu0 %v5697_v26, %s5318_s26  ;;  %v4885_v26 = vld [vmem:[%s6187_s1 + $0x4] sm:$0xf]  ;;  %v2734_v51 = vsel %vm450_vm4, %v2728_v40, %v2730_v45  ;;  %v2740_v60 = vsel %vm220_vm2, %v2733_v56, 0  ;;  %v4918_v56 = vld [vmem:[%s6187_s1 + $0x1c] sm:$0xf] }
 0x119   : > { %5158 = vmatmul.mubr.msk.bf16.vlgmr.msra.gmra.mrb[68].mxu1 %vm216_vm3, %v4876_v38  ;;  %2546 = vmatprep.mubr.bf16.mxu0 %v5309_v6 }
 0x11a   : > { %5162 = vmatpush3.bf16.msra.mxu1 %v2512_v42  ;;  %5163 = vmatprep.mubr.msk.bf16.mxu1 %vm5310_vm0, %v5308_v5 }
 0x11b   : > { %4495 = vrot.lane.b32.xlu1 %v5707_v30, %s5317_s25  ;;  %4890 = vmatprep.subr.msk.bf16.mxu0 %vm220_vm2, %v2611_v43  ;;  %v2732_v47 = vpop.permute.xlu1 %2731 }
 0x11c   : > { %4624 = vrot.lane.b32.xlu0 %v5712_v31, %s5318_s26  ;;  %5167 = vmatprep.subr.bf16.mxu1 %v5308_v5  ;;  %v2735_v58 = vsel %vm450_vm4, %v2730_v45, %v2732_v47  ;;  %v4913_v45 = vld [vmem:[%s6187_s1 + $0x18] sm:$0xf] }
 0x11d   : > { %v2746_v63 = vsel %vm220_vm2, %v2735_v58, 0 }
 0x11e   : > { %v2853_v52 = vpop.permute.xlu0 %2852 }
 0x11f   : > { %4888 = vmatmul.mubr.msk.bf16.vlgmr.msra.gmra.mrb[72].mxu0 %vm216_vm3, %v4885_v26  ;;  %4499 = vrot.lane.b32.xlu1 %v5724_v33, %s5317_s25  ;;  %v2855_v31 = vpop.permute.xlu1 %2854 }
 0x120   : > { %2625 = vmatpush1.bf16.msra.mxu0 %v2616_v48  ;;  %1326 = vperm.xlu0 %5290, %v180_v49   ;;  %v2860_v0 = vsel %vm579_vm5, %v2853_v52, %v2855_v31 }
 0x121   : > { %5164 = vmatmul.mubr.msk.bf16.vlgmr.msra.gmra.mrb[72].mxu1 %vm216_vm3, %v4885_v26  ;;  %4895 = vmatprep.subr.msk.bf16.mxu0 %vm220_vm2, %v2734_v51  ;;  %v2867_v3 = vsel %vm220_vm2, %v2860_v0, 0 }
 0x122   : > { %5168 = vmatpush3.bf16.msra.mxu1 %v2622_v54  ;;  %2656 = vmatprep.mubr.bf16.mxu0 %v5309_v6 }
 0x123   : > { %4622 = vrot.lane.b32.xlu1 %v5707_v30, %s5318_s26  ;;  %5169 = vmatprep.mubr.msk.bf16.mxu1 %vm5310_vm0, %v5308_v5  ;;  %v2857_v57 = vpop.permute.xlu0 %2856 }
 0x124   : > { %5173 = vmatprep.subr.bf16.mxu1 %v5308_v5  ;;  %v2861_v61 = vsel %vm579_vm5, %v2855_v31, %v2857_v57 }
 0x126   : > { %v2859_v62 = vpop.permute.xlu1 %2858 }
 0x127   : > { %4891 = vmatmul.mubr.msk.bf16.vlgmr.msra.gmra.mrb[76].mxu0 %vm216_vm3, %v2468_v59  ;;  %4626 = vrot.lane.b32.xlu1 %v5724_v33, %s5318_s26  ;;  %v2980_v30 = vpop.permute.xlu0 %2979  ;;  %v2862_v2 = vsel %vm579_vm5, %v2857_v57, %v2859_v62  ;;  %v4893_v33 = vld [vmem:[%s6187_s1 + $0x8] sm:$0xf] }
 0x128   : > { %2749 = vmatpush1.bf16.msra.mxu0 %v2740_v60  ;;  %2780 = vmatprep.mubr.bf16.mxu0 %v5309_v6  ;;  %v2873_v8 = vsel %vm220_vm2, %v2862_v2, 0  ;;  %v4931_v60 = vld [vmem:[%s5358_s18 + $0x18] sm:$0x3f] }
 0x129   : > { %5170 = vmatmul.mubr.msk.bf16.vlgmr.msra.gmra.mrb[76].mxu1 %vm216_vm3, %v2468_v59  ;;  %4900 = vmatprep.subr.msk.bf16.mxu0 %vm220_vm2, %v2861_v61 }
 0x12a   : > { %5174 = vmatpush3.bf16.msra.mxu1 %v2746_v63  ;;  %5175 = vmatprep.mubr.msk.bf16.mxu1 %vm5310_vm0, %v5308_v5 }
 0x12b   : > { %5179 = vmatprep.subr.bf16.mxu1 %v5308_v5  ;;  %v2982_v1 = vpop.permute.xlu1 %2981 }
 0x12c   : > { %v2987_v11 = vsel %vm708_vm6, %v2980_v30, %v2982_v1  ;;  %v3736_v30 = vrot.slane %v4931_v60, %v5352_v7 }
 0x12d   : > { %v2994_v16 = vsel %vm220_vm2, %v2987_v11, 0 }
 0x12e   : > { %v2984_v4 = vpop.permute.xlu0 %2983 }
 0x12f   : > { %4896 = vmatmul.mubr.msk.bf16.vlgmr.msra.gmra.mrb[80].mxu0 %vm216_vm3, %v4893_v33  ;;  %v2988_v9 = vsel %vm708_vm6, %v2982_v1, %v2984_v4  ;;  %v2986_v10 = vpop.permute.xlu1 %2985 }
 0x130   : > { %2876 = vmatpush1.bf16.msra.mxu0 %v2867_v3  ;;  %2907 = vmatprep.mubr.bf16.mxu0 %v5309_v6  ;;  %v2989_v13 = vsel %vm708_vm6, %v2984_v4, %v2986_v10  ;;  %v3744_v4 = vcombine.high %v3736_v30, %v3736_v30  ;;  %v3729_v10 = vcombine.high %v4931_v60, %v4931_v60 }
 0x131   : > { %5176 = vmatmul.mubr.msk.bf16.vlgmr.msra.gmra.mrb[80].mxu1 %vm216_vm3, %v4893_v33  ;;  %4905 = vmatprep.subr.msk.bf16.mxu0 %vm220_vm2, %v2988_v9  ;;  %v3000_v18 = vsel %vm220_vm2, %v2989_v13, 0  ;;  %v4923_v33 = vld [vmem:[%s6187_s1 + $0x20] sm:$0xf] }
 0x132   : > { %5180 = vmatpush3.bf16.msra.mxu1 %v2873_v8  ;;  %v3107_v12 = vpop.permute.xlu0 %3106  ;;  %5181 = vmatprep.mubr.msk.bf16.mxu1 %vm5310_vm0, %v5308_v5 }
 0x133   : > { %5185 = vmatprep.subr.bf16.mxu1 %v5308_v5 }
 0x134   : > { %v3109_v15 = vpop.permute.xlu1 %3108 }
 0x135   : > { %v3114_v21 = vsel %vm837_vm7, %v3107_v12, %v3109_v15 }
 0x136   : > { %v3111_v17 = vpop.permute.xlu0 %3110  ;;  %v3121_v25 = vsel %vm220_vm2, %v3114_v21, 0  ;;  %v3749_v21 = vsel %vm220_vm2, %v3736_v30, 0 }
 0x137   : > { %4901 = vmatmul.mubr.msk.bf16.vlgmr.msra.gmra.mrb[84].mxu0 %vm216_vm3, %v4898_v14  ;;  %v3115_v19 = vsel %vm837_vm7, %v3109_v15, %v3111_v17  ;;  %v3743_v15 = vrot.slane %v3729_v10, %v5352_v7 }
 0x138   : > { %3003 = vmatpush1.bf16.msra.mxu0 %v2994_v16  ;;  %v3113_v20 = vpop.permute.xlu1 %3112  ;;  %3034 = vmatprep.mubr.bf16.mxu0 %v5309_v6 }
 0x139   : > { %5182 = vmatmul.mubr.msk.bf16.vlgmr.msra.gmra.mrb[84].mxu1 %vm216_vm3, %v4898_v14  ;;  %4910 = vmatprep.subr.msk.bf16.mxu0 %vm220_vm2, %v3115_v19  ;;  %v3116_v23 = vsel %vm837_vm7, %v3111_v17, %v3113_v20 }
 0x13a   : > { %5186 = vmatpush3.bf16.msra.mxu1 %v3000_v18  ;;  %v3234_v22 = vpop.permute.xlu0 %3233  ;;  %5187 = vmatprep.mubr.msk.bf16.mxu1 %vm5310_vm0, %v5308_v5  ;;  %v3127_v27 = vsel %vm220_vm2, %v3116_v23, 0  ;;  %v4932_v18 = vld [vmem:[%s6187_s1 + $0x4] sm:$0xf] }
 0x13b   : > { %5191 = vmatprep.subr.bf16.mxu1 %v5308_v5 }
 0x13c   : > { %v3236_v24 = vpop.permute.xlu1 %3235 }
 0x13d   : > { %v3241_v53 = vsel %vm966_vm8, %v3234_v22, %v3236_v24 }
 0x13e   : > { %v3238_v50 = vpop.permute.xlu0 %3237  ;;  %v3248_v36 = vsel %vm220_vm2, %v3241_v53, 0 }
 0x13f   : > { %4906 = vmatmul.mubr.msk.bf16.vlgmr.msra.gmra.mrb[88].mxu0 %vm216_vm3, %v4903_v41  ;;  %v3242_v28 = vsel %vm966_vm8, %v3236_v24, %v3238_v50  ;;  %v3755_v24 = vsel %vm220_vm2, %v3743_v15, 0 }
 0x140   : > { %3130 = vmatpush1.bf16.msra.mxu0 %v3121_v25  ;;  %v3240_v29 = vpop.permute.xlu1 %3239  ;;  %3161 = vmatprep.mubr.bf16.mxu0 %v5309_v6 }
 0x141   : > { %5188 = vmatmul.mubr.msk.bf16.vlgmr.msra.gmra.mrb[88].mxu1 %vm216_vm3, %v4903_v41  ;;  %4915 = vmatprep.subr.msk.bf16.mxu0 %vm220_vm2, %v3242_v28  ;;  %v3243_v55 = vsel %vm966_vm8, %v3238_v50, %v3240_v29 }
 0x142   : > { %5192 = vmatpush3.bf16.msra.mxu1 %v3127_v27  ;;  %v3361_v32 = vpop.permute.xlu0 %3360  ;;  %5193 = vmatprep.mubr.msk.bf16.mxu1 %vm5310_vm0, %v5308_v5  ;;  %v3254_v38 = vsel %vm220_vm2, %v3243_v55, 0 }
 0x143   : > { %5197 = vmatprep.subr.bf16.mxu1 %v5308_v5 }
 0x144   : > { %v3363_v35 = vpop.permute.xlu1 %3362 }
 0x145   : > { %v3368_v42 = vsel %vm1095_vm9, %v3361_v32, %v3363_v35 }
 0x146   : > { %v3365_v37 = vpop.permute.xlu0 %3364  ;;  %v3375_v46 = vsel %vm220_vm2, %v3368_v42, 0 }
 0x147   : > { %4911 = vmatmul.mubr.msk.bf16.vlgmr.msra.gmra.mrb[92].mxu0 %vm216_vm3, %v4908_v34  ;;  %v3369_v39 = vsel %vm1095_vm9, %v3363_v35, %v3365_v37 }
 0x148   : > { %3257 = vmatpush1.bf16.msra.mxu0 %v3248_v36  ;;  %v3367_v40 = vpop.permute.xlu1 %3366  ;;  %3288 = vmatprep.mubr.bf16.mxu0 %v5309_v6  ;;  %v3601_v36 = vld [vmem:[%s6187_s1] sm:$0xf] }
 0x149   : > { %5194 = vmatmul.mubr.msk.bf16.vlgmr.msra.gmra.mrb[92].mxu1 %vm216_vm3, %v4908_v34  ;;  %4920 = vmatprep.subr.msk.bf16.mxu0 %vm220_vm2, %v3369_v39  ;;  %v3370_v44 = vsel %vm1095_vm9, %v3365_v37, %v3367_v40 }
 0x14a   : > { %5198 = vmatpush3.bf16.msra.mxu1 %v3254_v38  ;;  %v3488_v43 = vpop.permute.xlu0 %3487  ;;  %5199 = vmatprep.mubr.msk.bf16.mxu1 %vm5310_vm0, %v5308_v5  ;;  %v3381_v48 = vsel %vm220_vm2, %v3370_v44, 0 }
 0x14b   : > { %5203 = vmatprep.subr.bf16.mxu1 %v5308_v5 }
 0x14d   : > { %v3490_v47 = vpop.permute.xlu1 %3489 }
 0x14e   : > { %v3492_v26 = vpop.permute.xlu0 %3491  ;;  %v3495_v52 = vsel %vm1224_vm10, %v3488_v43, %v3490_v47 }
 0x14f   : > { %4916 = vmatmul.mubr.msk.bf16.vlgmr.msra.gmra.mrb[96].mxu0 %vm216_vm3, %v4913_v45  ;;  %v3496_v49 = vsel %vm1224_vm10, %v3490_v47, %v3492_v26  ;;  %v3502_v57 = vsel %vm220_vm2, %v3495_v52, 0 }
 0x150   : > { %3384 = vmatpush1.bf16.msra.mxu0 %v3375_v46  ;;  %3415 = vmatprep.mubr.bf16.mxu0 %v5309_v6 }
 0x151   : > { %5200 = vmatmul.mubr.msk.bf16.vlgmr.msra.gmra.mrb[96].mxu1 %vm216_vm3, %v4913_v45  ;;  %4925 = vmatprep.subr.msk.bf16.mxu0 %vm220_vm2, %v3496_v49  ;;  %v3494_v51 = vpop.permute.xlu1 %3493 }
 0x152   : > { %5204 = vmatpush3.bf16.msra.mxu1 %v3381_v48  ;;  %v3625_v54 = vpop.permute.xlu0 %3624  ;;  %5205 = vmatprep.mubr.msk.bf16.mxu1 %vm5310_vm0, %v5308_v5  ;;  %v3497_v31 = vsel %vm1224_vm10, %v3492_v26, %v3494_v51 }
 0x153   : > { %5209 = vmatprep.subr.bf16.mxu1 %v5308_v5  ;;  %v3508_v61 = vsel %vm220_vm2, %v3497_v31, 0 }
 0x155   : > { %v3627_v58 = vpop.permute.xlu1 %3626 }
 0x156   : > { %v3629_v59 = vpop.permute.xlu0 %3628  ;;  %v3632_v0 = vsel %vm212_vm1, %v3625_v54, %v3627_v58 }
 0x157   : > { %4921 = vmatmul.mubr.msk.bf16.vlgmr.msra.gmra.mrb[100].mxu0 %vm216_vm3, %v4918_v56  ;;  %v3633_v62 = vsel %vm212_vm1, %v3627_v58, %v3629_v59  ;;  %v3639_v3 = vsel %vm220_vm2, %v3632_v0, 0 }
 0x158   : > { %3511 = vmatpush1.bf16.msra.mxu0 %v3502_v57  ;;  %3542 = vmatprep.mubr.bf16.mxu0 %v5309_v6 }
 0x159   : > { %5206 = vmatmul.mubr.msk.bf16.vlgmr.msra.gmra.mrb[100].mxu1 %vm216_vm3, %v4918_v56  ;;  %4934 = vmatprep.subr.msk.bf16.mxu0 %vm220_vm2, %v3633_v62  ;;  %v3631_v63 = vpop.permute.xlu1 %3630 }
 0x15a   : > { %5210 = vmatpush3.bf16.msra.mxu1 %v3508_v61  ;;  %5211 = vmatprep.mubr.msk.bf16.mxu1 %vm5310_vm0, %v5308_v5  ;;  %v3859_v1 = vpop.permute.xlu0 %3858  ;;  %v3634_v2 = vsel %vm212_vm1, %v3629_v59, %v3631_v63  ;;  %v4940_v59 = vld [vmem:[%s6187_s1 + $0x8] sm:$0xf] }
 0x15b   : > { %5215 = vmatprep.subr.bf16.mxu1 %v5308_v5  ;;  %v3645_v9 = vsel %vm220_vm2, %v3634_v2, 0 }
 0x15e   : > { %v3863_v8 = vpop.permute.xlu0 %3862  ;;  %v3861_v11 = vpop.permute.xlu1 %3860 }
 0x15f   : > { %4926 = vmatmul.mubr.msk.bf16.vlgmr.msra.gmra.mrb[104].mxu0 %vm216_vm3, %v4923_v33  ;;  %v3867_v23 = vsel %vm450_vm4, %v3861_v11, %v3863_v8  ;;  %v3866_v50 = vsel %vm450_vm4, %v3859_v1, %v3861_v11 }
 0x160   : > { %3648 = vmatpush1.bf16.msra.mxu0 %v3639_v3  ;;  %3679 = vmatprep.mubr.bf16.mxu0 %v5309_v6  ;;  %v3873_v37 = vsel %vm220_vm2, %v3866_v50, 0 }
 0x161   : > { %5212 = vmatmul.mubr.msk.bf16.vlgmr.msra.gmra.mrb[104].mxu1 %vm216_vm3, %v4923_v33  ;;  %4937 = vmatprep.subr.msk.bf16.mxu0 %vm220_vm2, %v3744_v4 }
 0x162   : > { %5216 = vmatpush3.bf16.msra.mxu1 %v3645_v9  ;;  %v264_v12 = vpop.f32.mrb[0].mxu0  ;;  %5217 = vmatprep.mubr.msk.bf16.mxu1 %vm5310_vm0, %v5308_v5  ;;  %v3986_v13 = vpop.permute.xlu0 %3985 }
 0x163   : > { %v266_v14 = vpop.f32.mrb[1].mxu0  ;;  %5221 = vmatprep.subr.bf16.mxu1 %v5308_v5 }
 0x164   : > { %v268_v16 = vpop.f32.mrb[2].mxu0  ;;  %v305_v17 = vpop.f32.mrb[0].mxu1 }
 0x165   : > { %v269_v19 = vpop.f32.mrb[3].mxu0  ;;  %v5057_v20 = vpop.f32.mrb[1].mxu1 }
 0x166   : > { %v308_v22 = vpop.f32.mrb[2].mxu1  ;;  %v3990_v25 = vpop.permute.xlu0 %3989 }
 0x167   : > { %v5058_v41 = vpop.f32.mrb[3].mxu1  ;;  %4935 = vmatmul.mubr.msk.bf16.vlgmr.msra.gmra.mrb[108].mxu0 %vm216_vm3, %v4932_v18  ;;  %v3865_v7 = vpop.permute.xlu1 %3864 }
 0x168   : > { %3758 = vmatpush1.bf16.msra.mxu0 %v3749_v21  ;;  %3789 = vmatprep.mubr.bf16.mxu0 %v5309_v6  ;;  %v3868_v35 = vsel %vm450_vm4, %v3863_v8, %v3865_v7 }
 0x169   : > { %5218 = vmatmul.mubr.msk.bf16.vlgmr.msra.gmra.mrb[108].mxu1 %vm216_vm3, %v4932_v18  ;;  %4942 = vmatprep.subr.msk.bf16.mxu0 %vm220_vm2, %v3867_v23  ;;  %v3879_v44 = vsel %vm220_vm2, %v3868_v35, 0 }
 0x16a   : > { %v374_v27 = vpop.f32.mrb[4].mxu0  ;;  %5222 = vmatpush3.bf16.msra.mxu1 %v3755_v24  ;;  %5223 = vmatprep.mubr.msk.bf16.mxu1 %vm5310_vm0, %v5308_v5  ;;  %v4113_v53 = vpop.permute.xlu0 %4112 }
 0x16b   : > { %v375_v28 = vadd.f32 %v374_v27, %v264_v12  ;;  %v376_v29 = vpop.f32.mrb[5].mxu0  ;;  %5227 = vmatprep.subr.bf16.mxu1 %v5308_v5 }
 0x16c   : > { %v377_v32 = vadd.f32 %v376_v29, %v266_v14  ;;  %v378_v55 = vpop.f32.mrb[6].mxu0  ;;  %v415_v34 = vpop.f32.mrb[4].mxu1 }
 0x16d   : > { %v416_v38 = vadd.f32 %v415_v34, %v305_v17  ;;  %v379_v39 = vpop.f32.mrb[7].mxu0  ;;  %v5063_v40 = vpop.f32.mrb[5].mxu1  ;;  %v4945_v17 = vld [vmem:[%s6187_s1 + $0xc] sm:$0xf] }
 0x16e   : > { %v418_v42 = vpop.f32.mrb[6].mxu1  ;;  %v3988_v43 = vpop.permute.xlu1 %3987 }
 0x16f   : > { %v5064_v45 = vpop.f32.mrb[7].mxu1  ;;  %4938 = vmatmul.mubr.msk.bf16.vlgmr.msra.gmra.mrb[112].mxu0 %vm216_vm3, %v3601_v36  ;;  %v3994_v46 = vsel %vm579_vm5, %v3988_v43, %v3990_v25  ;;  %v4117_v47 = vpop.permute.xlu0 %4116  ;;  %v3993_v26 = vsel %vm579_vm5, %v3986_v13, %v3988_v43 }
 0x170   : > { %3882 = vmatpush1.bf16.msra.mxu0 %v3873_v37  ;;  %3913 = vmatprep.mubr.bf16.mxu0 %v5309_v6  ;;  %v4000_v60 = vsel %vm220_vm2, %v3993_v26, 0  ;;  %v4950_v37 = vld [vmem:[%s6187_s1 + $0x10] sm:$0xf] }
 0x171   : > { %5224 = vmatmul.mubr.msk.bf16.vlgmr.msra.gmra.mrb[112].mxu1 %vm216_vm3, %v3601_v36  ;;  %4947 = vmatprep.subr.msk.bf16.mxu0 %vm220_vm2, %v3994_v46 }
 0x172   : > { %5228 = vmatpush3.bf16.msra.mxu1 %v3879_v44  ;;  %v500_v48 = vpop.f32.mrb[8].mxu0  ;;  %v3992_v49 = vpop.permute.xlu1 %3991  ;;  %5229 = vmatprep.mubr.msk.bf16.mxu1 %vm5310_vm0, %v5308_v5 }
 0x173   : > { %v547_v51 = vadd.f32 %v500_v48, %v375_v28  ;;  %v502_v52 = vpop.f32.mrb[9].mxu0  ;;  %5233 = vmatprep.subr.bf16.mxu1 %v5308_v5  ;;  %v4240_v54 = vpop.permute.xlu0 %4239  ;;  %v3995_v58 = vsel %vm579_vm5, %v3990_v25, %v3992_v49 }
 0x174   : > { %v548_v31 = vadd.f32 %v502_v52, %v377_v32  ;;  %v504_v56 = vpop.f32.mrb[10].mxu0  ;;  %v541_v57 = vpop.f32.mrb[8].mxu1  ;;  %v4006_v1 = vsel %vm220_vm2, %v3995_v58, 0 }
 0x175   : > { %v549_v61 = vadd.f32 %v541_v57, %v416_v38  ;;  %v505_v62 = vpop.f32.mrb[11].mxu0  ;;  %v5069_v63 = vpop.f32.mrb[9].mxu1 }
 0x176   : > { %v544_v30 = vpop.f32.mrb[10].mxu1  ;;  %v4115_v0 = vpop.permute.xlu1 %4114 }
 0x177   : > { %v5070_v2 = vpop.f32.mrb[11].mxu1  ;;  %4943 = vmatmul.mubr.msk.bf16.vlgmr.msra.gmra.mrb[116].mxu0 %vm216_vm3, %v4940_v59  ;;  %v4121_v33 = vsel %vm708_vm6, %v4115_v0, %v4117_v47  ;;  %v4244_v3 = vpop.permute.xlu0 %4243  ;;  %v4120_v4 = vsel %vm708_vm6, %v4113_v53, %v4115_v0 }
 0x178   : > { %4009 = vmatpush1.bf16.msra.mxu0 %v4000_v60  ;;  %4040 = vmatprep.mubr.bf16.mxu0 %v5309_v6  ;;  %v4127_v18 = vsel %vm220_vm2, %v4120_v4, 0  ;;  %v4955_v60 = vld [vmem:[%s6187_s1 + $0x14] sm:$0xf] }
 0x179   : > { %5230 = vmatmul.mubr.msk.bf16.vlgmr.msra.gmra.mrb[116].mxu1 %vm216_vm3, %v4940_v59  ;;  %4952 = vmatprep.subr.msk.bf16.mxu0 %vm220_vm2, %v4121_v33 }
 0x17a   : > { %5234 = vmatpush3.bf16.msra.mxu1 %v4006_v1  ;;  %v629_v8 = vpop.f32.mrb[12].mxu0  ;;  %v4119_v9 = vpop.permute.xlu1 %4118  ;;  %5235 = vmatprep.mubr.msk.bf16.mxu1 %vm5310_vm0, %v5308_v5 }
 0x17b   : > { %v676_v10 = vadd.f32 %v629_v8, %v547_v51  ;;  %v631_v11 = vpop.f32.mrb[13].mxu0  ;;  %5239 = vmatprep.subr.bf16.mxu1 %v5308_v5  ;;  %v4367_v12 = vpop.permute.xlu0 %4366  ;;  %v4122_v16 = vsel %vm708_vm6, %v4117_v47, %v4119_v9 }
 0x17c   : > { %v677_v13 = vadd.f32 %v631_v11, %v548_v31  ;;  %v633_v14 = vpop.f32.mrb[14].mxu0  ;;  %v670_v15 = vpop.f32.mrb[12].mxu1  ;;  %v4133_v41 = vsel %vm220_vm2, %v4122_v16, 0 }
 0x17d   : > { %v678_v19 = vadd.f32 %v670_v15, %v549_v61  ;;  %v634_v20 = vpop.f32.mrb[15].mxu0  ;;  %v5075_v21 = vpop.f32.mrb[13].mxu1 }
 0x17e   : > { %v673_v22 = vpop.f32.mrb[14].mxu1  ;;  %v4242_v23 = vpop.permute.xlu1 %4241 }
 0x17f   : > { %v5076_v24 = vpop.f32.mrb[15].mxu1  ;;  %4948 = vmatmul.mubr.msk.bf16.vlgmr.msra.gmra.mrb[120].mxu0 %vm216_vm3, %v4945_v17  ;;  %v4248_v25 = vsel %vm837_vm7, %v4242_v23, %v4244_v3  ;;  %v4371_v7 = vpop.permute.xlu0 %4370  ;;  %v4247_v50 = vsel %vm837_vm7, %v4240_v54, %v4242_v23 }
 0x180   : > { %4136 = vmatpush1.bf16.msra.mxu0 %v4127_v18  ;;  %4167 = vmatprep.mubr.bf16.mxu0 %v5309_v6  ;;  %v4254_v38 = vsel %vm220_vm2, %v4247_v50, 0 }
 0x181   : > { %5236 = vmatmul.mubr.msk.bf16.vlgmr.msra.gmra.mrb[120].mxu1 %vm216_vm3, %v4945_v17  ;;  %4957 = vmatprep.subr.msk.bf16.mxu0 %vm220_vm2, %v4248_v25  ;;  %v4960_v17 = vld [vmem:[%s6187_s1 + $0x18] sm:$0xf] }
 0x182   : > { %5240 = vmatpush3.bf16.msra.mxu1 %v4133_v41  ;;  %v758_v27 = vpop.f32.mrb[16].mxu0  ;;  %v4246_v28 = vpop.permute.xlu1 %4245  ;;  %5241 = vmatprep.mubr.msk.bf16.mxu1 %vm5310_vm0, %v5308_v5 }
 0x183   : > { %v805_v29 = vadd.f32 %v758_v27, %v676_v10  ;;  %v760_v53 = vpop.f32.mrb[17].mxu0  ;;  %5245 = vmatprep.subr.bf16.mxu1 %v5308_v5  ;;  %v4494_v32 = vpop.permute.xlu0 %4493  ;;  %v4249_v36 = vsel %vm837_vm7, %v4244_v3, %v4246_v28 }
 0x184   : > { %v806_v55 = vadd.f32 %v760_v53, %v677_v13  ;;  %v762_v34 = vpop.f32.mrb[18].mxu0  ;;  %v799_v35 = vpop.f32.mrb[16].mxu1  ;;  %v4260_v45 = vsel %vm220_vm2, %v4249_v36, 0 }
 0x185   : > { %v807_v39 = vadd.f32 %v799_v35, %v678_v19  ;;  %v763_v40 = vpop.f32.mrb[19].mxu0  ;;  %v5081_v42 = vpop.f32.mrb[17].mxu1  ;;  %v4965_v35 = vld [vmem:[%s6187_s1 + $0x1c] sm:$0xf] }
 0x186   : > { %v802_v43 = vpop.f32.mrb[18].mxu1  ;;  %v4369_v44 = vpop.permute.xlu1 %4368 }
 0x187   : > { %v5082_v46 = vpop.f32.mrb[19].mxu1  ;;  %4953 = vmatmul.mubr.msk.bf16.vlgmr.msra.gmra.mrb[124].mxu0 %vm216_vm3, %v4950_v37  ;;  %v4375_v47 = vsel %vm966_vm8, %v4369_v44, %v4371_v7  ;;  %v4498_v26 = vpop.permute.xlu0 %4497  ;;  %v4374_v48 = vsel %vm966_vm8, %v4367_v12, %v4369_v44 }
 0x188   : > { %4263 = vmatpush1.bf16.msra.mxu0 %v4254_v38  ;;  %4294 = vmatprep.mubr.bf16.mxu0 %v5309_v6  ;;  %v4381_v61 = vsel %vm220_vm2, %v4374_v48, 0 }
 0x189   : > { %5242 = vmatmul.mubr.msk.bf16.vlgmr.msra.gmra.mrb[124].mxu1 %vm216_vm3, %v4950_v37  ;;  %4962 = vmatprep.subr.msk.bf16.mxu0 %vm220_vm2, %v4375_v47 }
 0x18a   : > { %5246 = vmatpush3.bf16.msra.mxu1 %v4260_v45  ;;  %v887_v49 = vpop.f32.mrb[20].mxu0  ;;  %v4373_v51 = vpop.permute.xlu1 %4372  ;;  %5247 = vmatprep.mubr.msk.bf16.mxu1 %vm5310_vm0, %v5308_v5 }
 0x18b   : > { %v934_v52 = vadd.f32 %v887_v49, %v805_v29  ;;  %v889_v54 = vpop.f32.mrb[21].mxu0  ;;  %5251 = vmatprep.subr.bf16.mxu1 %v5308_v5  ;;  %v4621_v31 = vpop.permute.xlu0 %4620  ;;  %v4376_v59 = vsel %vm966_vm8, %v4371_v7, %v4373_v51  ;;  %v4970_v49 = vld [vmem:[%s6187_s1 + $0x20] sm:$0xf] }
 0x18c   : > { %v935_v56 = vadd.f32 %v889_v54, %v806_v55  ;;  %v891_v57 = vpop.f32.mrb[22].mxu0  ;;  %v928_v58 = vpop.f32.mrb[20].mxu1  ;;  %v4387_v2 = vsel %vm220_vm2, %v4376_v59, 0 }
 0x18d   : > { %v936_v62 = vadd.f32 %v928_v58, %v807_v39  ;;  %v892_v63 = vpop.f32.mrb[23].mxu0  ;;  %v5087_v30 = vpop.f32.mrb[21].mxu1 }
 0x18e   : > { %v931_v0 = vpop.f32.mrb[22].mxu1  ;;  %v4496_v1 = vpop.permute.xlu1 %4495 }
 0x18f   : > { %v5088_v33 = vpop.f32.mrb[23].mxu1  ;;  %4958 = vmatmul.mubr.msk.bf16.vlgmr.msra.gmra.mrb[128].mxu0 %vm216_vm3, %v4955_v60  ;;  %v4502_v3 = vsel %vm1095_vm9, %v4496_v1, %v4498_v26  ;;  %v4501_v4 = vsel %vm1095_vm9, %v4494_v32, %v4496_v1  ;;  %v4625_v12 = vpop.permute.xlu0 %4624 }
 0x190   : > { %4390 = vmatpush1.bf16.msra.mxu0 %v4381_v61  ;;  %4421 = vmatprep.mubr.bf16.mxu0 %v5309_v6  ;;  %v4508_v18 = vsel %vm220_vm2, %v4501_v4, 0 }
 0x191   : > { %5248 = vmatmul.mubr.msk.bf16.vlgmr.msra.gmra.mrb[128].mxu1 %vm216_vm3, %v4955_v60  ;;  %4967 = vmatprep.subr.msk.bf16.mxu0 %vm220_vm2, %v4502_v3 }
 0x192   : > { %5252 = vmatpush3.bf16.msra.mxu1 %v4387_v2  ;;  %v1016_v8 = vpop.f32.mrb[24].mxu0  ;;  %v4500_v9 = vpop.permute.xlu1 %4499  ;;  %5253 = vmatprep.mubr.msk.bf16.mxu1 %vm5310_vm0, %v5308_v5 }
 0x193   : > { %v1063_v10 = vadd.f32 %v1016_v8, %v934_v52  ;;  %v1018_v11 = vpop.f32.mrb[25].mxu0  ;;  %5257 = vmatprep.subr.bf16.mxu1 %v5308_v5  ;;  %v4503_v16 = vsel %vm1095_vm9, %v4498_v26, %v4500_v9 }
 0x194   : > { %v1064_v13 = vadd.f32 %v1018_v11, %v935_v56  ;;  %v1020_v14 = vpop.f32.mrb[26].mxu0  ;;  %v1057_v15 = vpop.f32.mrb[24].mxu1  ;;  %v4514_v41 = vsel %vm220_vm2, %v4503_v16, 0 }
 0x195   : > { %v1065_v19 = vadd.f32 %v1057_v15, %v936_v62  ;;  %v1021_v20 = vpop.f32.mrb[27].mxu0  ;;  %v5093_v21 = vpop.f32.mrb[25].mxu1 }
 0x196   : > { %v1060_v22 = vpop.f32.mrb[26].mxu1  ;;  %v4623_v23 = vpop.permute.xlu1 %4622 }
 0x197   : > { %v5094_v24 = vpop.f32.mrb[27].mxu1  ;;  %4963 = vmatmul.mubr.msk.bf16.vlgmr.msra.gmra.mrb[132].mxu0 %vm216_vm3, %v4960_v17  ;;  %v4629_v25 = vsel %vm1224_vm10, %v4623_v23, %v4625_v12  ;;  %v4628_v7 = vsel %vm1224_vm10, %v4621_v31, %v4623_v23 }
 0x198   : > { %4517 = vmatpush1.bf16.msra.mxu0 %v4508_v18  ;;  %4548 = vmatprep.mubr.bf16.mxu0 %v5309_v6  ;;  %v4635_v36 = vsel %vm220_vm2, %v4628_v7, 0 }
 0x199   : > { %5254 = vmatmul.mubr.msk.bf16.vlgmr.msra.gmra.mrb[132].mxu1 %vm216_vm3, %v4960_v17  ;;  %4972 = vmatprep.subr.msk.bf16.mxu0 %vm220_vm2, %v4629_v25 }
 0x19a   : > { %5258 = vmatpush3.bf16.msra.mxu1 %v4514_v41  ;;  %v1145_v50 = vpop.f32.mrb[28].mxu0  ;;  %v4627_v27 = vpop.permute.xlu1 %4626  ;;  %5259 = vmatprep.mubr.msk.bf16.mxu1 %vm5310_vm0, %v5308_v5 }
 0x19b   : > { %v1192_v28 = vadd.f32 %v1145_v50, %v1063_v10  ;;  %v1147_v29 = vpop.f32.mrb[29].mxu0  ;;  %5263 = vmatprep.subr.bf16.mxu1 %v5308_v5  ;;  %v4630_v34 = vsel %vm1224_vm10, %v4625_v12, %v4627_v27 }
 0x19c   : > { %v1193_v53 = vadd.f32 %v1147_v29, %v1064_v13  ;;  %v1149_v32 = vpop.f32.mrb[30].mxu0  ;;  %v1186_v55 = vpop.f32.mrb[28].mxu1  ;;  %v4641_v42 = vsel %vm220_vm2, %v4630_v34, 0 }
 0x19d   : > { %v1194_v37 = vadd.f32 %v1186_v55, %v1065_v19  ;;  %v1150_v38 = vpop.f32.mrb[31].mxu0  ;;  %v5099_v39 = vpop.f32.mrb[29].mxu1 }
 0x19e   : > { %v1189_v40 = vpop.f32.mrb[30].mxu1 }
 0x19f   : > { %v5100_v43 = vpop.f32.mrb[31].mxu1  ;;  %4968 = vmatmul.mubr.msk.bf16.vlgmr.msra.gmra.mrb[136].mxu0 %vm216_vm3, %v4965_v35  ;;  %v6145_v45 = vpop.permute.xlu0 %1326 }
 0x1a0   : > { %4644 = vmatpush1.bf16.msra.mxu0 %v4635_v36  ;;  %4675 = vmatprep.mubr.bf16.mxu0 %v5309_v6 }
 0x1a1   : > { %5260 = vmatmul.mubr.msk.bf16.vlgmr.msra.gmra.mrb[136].mxu1 %vm216_vm3, %v4965_v35 }
 0x1a2   : > { %5264 = vmatpush3.bf16.msra.mxu1 %v4641_v42  ;;  %v1274_v44 = vpop.f32.mrb[32].mxu0  ;;  %5265 = vmatprep.mubr.msk.bf16.mxu1 %vm5310_vm0, %v5308_v5 }
 0x1a3   : > { %v1321_v46 = vadd.f32 %v1274_v44, %v1192_v28  ;;  %v1276_v47 = vpop.f32.mrb[33].mxu0 }
 0x1a4   : > { %v1322_v26 = vadd.f32 %v1276_v47, %v1193_v53  ;;  %v1278_v48 = vpop.f32.mrb[34].mxu0  ;;  %v1315_v6 = vpop.f32.mrb[32].mxu1 }
 0x1a5   : > { %v1323_v51 = vadd.f32 %v1315_v6, %v1194_v37  ;;  %v1279_v52 = vpop.f32.mrb[35].mxu0  ;;  %v5105_v5 = vpop.f32.mrb[33].mxu1  ;;  %v1329_v54 = vadd.f32 %v6145_v45, %v1321_v46 }
 0x1a6   : > { %v1318_v31 = vpop.f32.mrb[34].mxu1  ;;  %v1330_v56 = vadd.f32 %v6145_v45, %v1322_v26 }
 0x1a7   : > { %v1331_v57 = vadd.f32 %v6145_v45, %v1323_v51  ;;  %v5106_v58 = vpop.f32.mrb[35].mxu1  ;;  %4973 = vmatmul.mubr.msk.bf16.vlgmr.msra.gmra.mrb[140].mxu0 %vm216_vm3, %v4970_v49  ;;  %1332 = vst [vmem:[%s6152_s9] sm:$0xff] %v1329_v54 }
 0x1a8   : > { %1333 = vst [vmem:[%s6152_s9 + $0x8] sm:$0xff] %v1330_v56 }
 0x1a9   : > { %1334 = vst [vmem:[%s6152_s9 + $0x10] sm:$0xff] %v1331_v57  ;;  %5266 = vmatmul.mubr.msk.bf16.vlgmr.msra.gmra.mrb[140].mxu1 %vm216_vm3, %v4970_v49 }
 0x1aa   : > { %v1415_v59 = vpop.f32.mrb[36].mxu0 }
 0x1ab   : > { %v1417_v60 = vpop.f32.mrb[37].mxu0 }
 0x1ac   : > { %v1419_v61 = vpop.f32.mrb[38].mxu0  ;;  %v1456_v62 = vpop.f32.mrb[36].mxu1 }
 0x1ad   : > { %v1420_v63 = vpop.f32.mrb[39].mxu0  ;;  %v5111_v30 = vpop.f32.mrb[37].mxu1 }
 0x1ae   : > { %v1459_v0 = vpop.f32.mrb[38].mxu1 }
 0x1af   : > { %v5112_v1 = vpop.f32.mrb[39].mxu1 }
 0x1b2   : > { %v1525_v2 = vpop.f32.mrb[40].mxu0 }
 0x1b3   : > { %v1526_v33 = vadd.f32 %v1525_v2, %v1415_v59  ;;  %v1527_v3 = vpop.f32.mrb[41].mxu0 }
 0x1b4   : > { %v1528_v4 = vadd.f32 %v1527_v3, %v1417_v60  ;;  %v1529_v8 = vpop.f32.mrb[42].mxu0  ;;  %v1566_v9 = vpop.f32.mrb[40].mxu1 }
 0x1b5   : > { %v1567_v10 = vadd.f32 %v1566_v9, %v1456_v62  ;;  %v1530_v11 = vpop.f32.mrb[43].mxu0  ;;  %v5117_v12 = vpop.f32.mrb[41].mxu1 }
 0x1b6   : > { %v1569_v13 = vpop.f32.mrb[42].mxu1 }
 0x1b7   : > { %v5118_v14 = vpop.f32.mrb[43].mxu1 }
 0x1ba   : > { %v1649_v15 = vpop.f32.mrb[44].mxu0 }
 0x1bb   : > { %v1696_v16 = vadd.f32 %v1649_v15, %v1526_v33  ;;  %v1651_v17 = vpop.f32.mrb[45].mxu0 }
 0x1bc   : > { %v1697_v18 = vadd.f32 %v1651_v17, %v1528_v4  ;;  %v1653_v19 = vpop.f32.mrb[46].mxu0  ;;  %v1690_v20 = vpop.f32.mrb[44].mxu1 }
 0x1bd   : > { %v1698_v21 = vadd.f32 %v1690_v20, %v1567_v10  ;;  %v1654_v22 = vpop.f32.mrb[47].mxu0  ;;  %v5123_v23 = vpop.f32.mrb[45].mxu1 }
 0x1be   : > { %v1693_v41 = vpop.f32.mrb[46].mxu1 }
 0x1bf   : > { %v5124_v24 = vpop.f32.mrb[47].mxu1 }
 0x1c2   : > { %v1776_v25 = vpop.f32.mrb[48].mxu0 }
 0x1c3   : > { %v1823_v7 = vadd.f32 %v1776_v25, %v1696_v16  ;;  %v1778_v50 = vpop.f32.mrb[49].mxu0 }
 0x1c4   : > { %v1824_v27 = vadd.f32 %v1778_v50, %v1697_v18  ;;  %v1780_v28 = vpop.f32.mrb[50].mxu0  ;;  %v1817_v29 = vpop.f32.mrb[48].mxu1 }
 0x1c5   : > { %v1825_v53 = vadd.f32 %v1817_v29, %v1698_v21  ;;  %v1781_v32 = vpop.f32.mrb[51].mxu0  ;;  %v5129_v55 = vpop.f32.mrb[49].mxu1 }
 0x1c6   : > { %v1820_v34 = vpop.f32.mrb[50].mxu1 }
 0x1c7   : > { %v5130_v35 = vpop.f32.mrb[51].mxu1 }
 0x1ca   : > { %v1903_v36 = vpop.f32.mrb[52].mxu0 }
 0x1cb   : > { %v1950_v37 = vadd.f32 %v1903_v36, %v1823_v7  ;;  %v1905_v38 = vpop.f32.mrb[53].mxu0 }
 0x1cc   : > { %v1951_v39 = vadd.f32 %v1905_v38, %v1824_v27  ;;  %v1907_v40 = vpop.f32.mrb[54].mxu0  ;;  %v1944_v42 = vpop.f32.mrb[52].mxu1 }
 0x1cd   : > { %v1952_v43 = vadd.f32 %v1944_v42, %v1825_v53  ;;  %v1908_v44 = vpop.f32.mrb[55].mxu0  ;;  %v5135_v46 = vpop.f32.mrb[53].mxu1 }
 0x1ce   : > { %v1947_v47 = vpop.f32.mrb[54].mxu1 }
 0x1cf   : > { %v5136_v26 = vpop.f32.mrb[55].mxu1 }
 0x1d2   : > { %v2030_v48 = vpop.f32.mrb[56].mxu0 }
 0x1d3   : > { %v2077_v6 = vadd.f32 %v2030_v48, %v1950_v37  ;;  %v2032_v49 = vpop.f32.mrb[57].mxu0 }
 0x1d4   : > { %v2078_v51 = vadd.f32 %v2032_v49, %v1951_v39  ;;  %v2034_v52 = vpop.f32.mrb[58].mxu0  ;;  %v2071_v5 = vpop.f32.mrb[56].mxu1 }
 0x1d5   : > { %v2079_v54 = vadd.f32 %v2071_v5, %v1952_v43  ;;  %v2035_v31 = vpop.f32.mrb[59].mxu0  ;;  %v5141_v56 = vpop.f32.mrb[57].mxu1 }
 0x1d6   : > { %v2074_v57 = vpop.f32.mrb[58].mxu1 }
 0x1d7   : > { %v5142_v58 = vpop.f32.mrb[59].mxu1 }
 0x1da   : > { %v2157_v59 = vpop.f32.mrb[60].mxu0 }
 0x1db   : > { %v2204_v60 = vadd.f32 %v2157_v59, %v2077_v6  ;;  %v2159_v61 = vpop.f32.mrb[61].mxu0 }
 0x1dc   : > { %v2205_v62 = vadd.f32 %v2159_v61, %v2078_v51  ;;  %v2161_v63 = vpop.f32.mrb[62].mxu0  ;;  %v2198_v30 = vpop.f32.mrb[60].mxu1 }
 0x1dd   : > { %v2206_v0 = vadd.f32 %v2198_v30, %v2079_v54  ;;  %v2162_v1 = vpop.f32.mrb[63].mxu0  ;;  %v5147_v2 = vpop.f32.mrb[61].mxu1 }
 0x1de   : > { %v2201_v33 = vpop.f32.mrb[62].mxu1 }
 0x1df   : > { %v5148_v3 = vpop.f32.mrb[63].mxu1 }
 0x1e2   : > { %v2284_v4 = vpop.f32.mrb[64].mxu0 }
 0x1e3   : > { %v2331_v8 = vadd.f32 %v2284_v4, %v2204_v60  ;;  %v2286_v9 = vpop.f32.mrb[65].mxu0 }
 0x1e4   : > { %v2332_v10 = vadd.f32 %v2286_v9, %v2205_v62  ;;  %v2288_v11 = vpop.f32.mrb[66].mxu0  ;;  %v2325_v12 = vpop.f32.mrb[64].mxu1 }
 0x1e5   : > { %v2333_v13 = vadd.f32 %v2325_v12, %v2206_v0  ;;  %v2289_v14 = vpop.f32.mrb[67].mxu0  ;;  %v5153_v15 = vpop.f32.mrb[65].mxu1 }
 0x1e6   : > { %v2328_v16 = vpop.f32.mrb[66].mxu1 }
 0x1e7   : > { %v5154_v17 = vpop.f32.mrb[67].mxu1 }
 0x1ea   : > { %v2411_v18 = vpop.f32.mrb[68].mxu0 }
 0x1eb   : > { %v2458_v19 = vadd.f32 %v2411_v18, %v2331_v8  ;;  %v2413_v20 = vpop.f32.mrb[69].mxu0 }
 0x1ec   : > { %v2459_v21 = vadd.f32 %v2413_v20, %v2332_v10  ;;  %v2415_v22 = vpop.f32.mrb[70].mxu0  ;;  %v2452_v23 = vpop.f32.mrb[68].mxu1 }
 0x1ed   : > { %v2461_v41 = vadd.f32 %v2458_v19, %v6145_v45  ;;  %v2460_v24 = vadd.f32 %v2452_v23, %v2333_v13  ;;  %v2416_v25 = vpop.f32.mrb[71].mxu0  ;;  %v5159_v7 = vpop.f32.mrb[69].mxu1 }
 0x1ee   : > { %v2462_v50 = vadd.f32 %v2459_v21, %v6145_v45  ;;  %v2455_v27 = vpop.f32.mrb[70].mxu1 }
 0x1ef   : > { %4881 = vst [vmem:[%s6152_s9 + $0x18] sm:$0xff] %v2461_v41  ;;  %v2463_v28 = vadd.f32 %v2460_v24, %v6145_v45  ;;  %v5160_v29 = vpop.f32.mrb[71].mxu1 }
 0x1f0   : > { %4882 = vst [vmem:[%s6152_s9 + $0x20] sm:$0xff] %v2462_v50 }
 0x1f1   : > { %4883 = vst [vmem:[%s6152_s9 + $0x28] sm:$0xff] %v2463_v28 }
 0x1f2   : > { %v2548_v53 = vpop.f32.mrb[72].mxu0 }
 0x1f3   : > { %v2550_v32 = vpop.f32.mrb[73].mxu0 }
 0x1f4   : > { %v2552_v55 = vpop.f32.mrb[74].mxu0  ;;  %v2589_v34 = vpop.f32.mrb[72].mxu1 }
 0x1f5   : > { %v2553_v35 = vpop.f32.mrb[75].mxu0  ;;  %v5165_v36 = vpop.f32.mrb[73].mxu1 }
 0x1f6   : > { %v2592_v37 = vpop.f32.mrb[74].mxu1 }
 0x1f7   : > { %v5166_v38 = vpop.f32.mrb[75].mxu1 }
 0x1fa   : > { %v2658_v39 = vpop.f32.mrb[76].mxu0 }
 0x1fb   : > { %v2659_v40 = vadd.f32 %v2658_v39, %v2548_v53  ;;  %v2660_v42 = vpop.f32.mrb[77].mxu0 }
 0x1fc   : > { %v2661_v43 = vadd.f32 %v2660_v42, %v2550_v32  ;;  %v2662_v44 = vpop.f32.mrb[78].mxu0  ;;  %v2699_v46 = vpop.f32.mrb[76].mxu1 }
 0x1fd   : > { %v2700_v47 = vadd.f32 %v2699_v46, %v2589_v34  ;;  %v2663_v26 = vpop.f32.mrb[79].mxu0  ;;  %v5171_v48 = vpop.f32.mrb[77].mxu1 }
 0x1fe   : > { %v2702_v6 = vpop.f32.mrb[78].mxu1 }
 0x1ff   : > { %v5172_v49 = vpop.f32.mrb[79].mxu1 }
 0x202   : > { %v2782_v51 = vpop.f32.mrb[80].mxu0 }
 0x203   : > { %v2829_v52 = vadd.f32 %v2782_v51, %v2659_v40  ;;  %v2784_v5 = vpop.f32.mrb[81].mxu0 }
 0x204   : > { %v2830_v54 = vadd.f32 %v2784_v5, %v2661_v43  ;;  %v2786_v31 = vpop.f32.mrb[82].mxu0  ;;  %v2823_v56 = vpop.f32.mrb[80].mxu1 }
 0x205   : > { %v2831_v57 = vadd.f32 %v2823_v56, %v2700_v47  ;;  %v2787_v58 = vpop.f32.mrb[83].mxu0  ;;  %v5177_v59 = vpop.f32.mrb[81].mxu1 }
 0x206   : > { %v2826_v60 = vpop.f32.mrb[82].mxu1 }
 0x207   : > { %v5178_v61 = vpop.f32.mrb[83].mxu1 }
 0x20a   : > { %v2909_v62 = vpop.f32.mrb[84].mxu0 }
 0x20b   : > { %v2956_v63 = vadd.f32 %v2909_v62, %v2829_v52  ;;  %v2911_v30 = vpop.f32.mrb[85].mxu0 }
 0x20c   : > { %v2957_v0 = vadd.f32 %v2911_v30, %v2830_v54  ;;  %v2913_v1 = vpop.f32.mrb[86].mxu0  ;;  %v2950_v2 = vpop.f32.mrb[84].mxu1 }
 0x20d   : > { %v2958_v33 = vadd.f32 %v2950_v2, %v2831_v57  ;;  %v2914_v3 = vpop.f32.mrb[87].mxu0  ;;  %v5183_v4 = vpop.f32.mrb[85].mxu1 }
 0x20e   : > { %v2953_v8 = vpop.f32.mrb[86].mxu1 }
 0x20f   : > { %v5184_v9 = vpop.f32.mrb[87].mxu1 }
 0x212   : > { %v3036_v10 = vpop.f32.mrb[88].mxu0 }
 0x213   : > { %v3083_v11 = vadd.f32 %v3036_v10, %v2956_v63  ;;  %v3038_v12 = vpop.f32.mrb[89].mxu0 }
 0x214   : > { %v3084_v13 = vadd.f32 %v3038_v12, %v2957_v0  ;;  %v3040_v14 = vpop.f32.mrb[90].mxu0  ;;  %v3077_v15 = vpop.f32.mrb[88].mxu1 }
 0x215   : > { %v3085_v16 = vadd.f32 %v3077_v15, %v2958_v33  ;;  %v3041_v17 = vpop.f32.mrb[91].mxu0  ;;  %v5189_v18 = vpop.f32.mrb[89].mxu1 }
 0x216   : > { %v3080_v19 = vpop.f32.mrb[90].mxu1 }
 0x217   : > { %v5190_v20 = vpop.f32.mrb[91].mxu1 }
 0x21a   : > { %v3163_v21 = vpop.f32.mrb[92].mxu0 }
 0x21b   : > { %v3210_v22 = vadd.f32 %v3163_v21, %v3083_v11  ;;  %v3165_v23 = vpop.f32.mrb[93].mxu0 }
 0x21c   : > { %v3211_v41 = vadd.f32 %v3165_v23, %v3084_v13  ;;  %v3167_v24 = vpop.f32.mrb[94].mxu0  ;;  %v3204_v25 = vpop.f32.mrb[92].mxu1 }
 0x21d   : > { %v3212_v7 = vadd.f32 %v3204_v25, %v3085_v16  ;;  %v3168_v50 = vpop.f32.mrb[95].mxu0  ;;  %v5195_v27 = vpop.f32.mrb[93].mxu1 }
 0x21e   : > { %v3207_v28 = vpop.f32.mrb[94].mxu1 }
 0x21f   : > { %v5196_v29 = vpop.f32.mrb[95].mxu1 }
 0x222   : > { %v3290_v53 = vpop.f32.mrb[96].mxu0 }
 0x223   : > { %v3337_v32 = vadd.f32 %v3290_v53, %v3210_v22  ;;  %v3292_v55 = vpop.f32.mrb[97].mxu0 }
 0x224   : > { %v3338_v34 = vadd.f32 %v3292_v55, %v3211_v41  ;;  %v3294_v35 = vpop.f32.mrb[98].mxu0  ;;  %v3331_v36 = vpop.f32.mrb[96].mxu1 }
 0x225   : > { %v3339_v37 = vadd.f32 %v3331_v36, %v3212_v7  ;;  %v3295_v38 = vpop.f32.mrb[99].mxu0  ;;  %v5201_v39 = vpop.f32.mrb[97].mxu1 }
 0x226   : > { %v3334_v40 = vpop.f32.mrb[98].mxu1 }
 0x227   : > { %v5202_v42 = vpop.f32.mrb[99].mxu1 }
 0x22a   : > { %v3417_v43 = vpop.f32.mrb[100].mxu0 }
 0x22b   : > { %v3464_v44 = vadd.f32 %v3417_v43, %v3337_v32  ;;  %v3419_v46 = vpop.f32.mrb[101].mxu0 }
 0x22c   : > { %v3465_v47 = vadd.f32 %v3419_v46, %v3338_v34  ;;  %v3421_v26 = vpop.f32.mrb[102].mxu0  ;;  %v3458_v48 = vpop.f32.mrb[100].mxu1 }
 0x22d   : > { %v3466_v6 = vadd.f32 %v3458_v48, %v3339_v37  ;;  %v3422_v49 = vpop.f32.mrb[103].mxu0  ;;  %v5207_v51 = vpop.f32.mrb[101].mxu1 }
 0x22e   : > { %v3461_v52 = vpop.f32.mrb[102].mxu1 }
 0x22f   : > { %v5208_v5 = vpop.f32.mrb[103].mxu1 }
 0x232   : > { %v3544_v54 = vpop.f32.mrb[104].mxu0 }
 0x233   : > { %v3591_v31 = vadd.f32 %v3544_v54, %v3464_v44  ;;  %v3546_v56 = vpop.f32.mrb[105].mxu0 }
 0x234   : > { %v3592_v57 = vadd.f32 %v3546_v56, %v3465_v47  ;;  %v3548_v58 = vpop.f32.mrb[106].mxu0  ;;  %v3585_v59 = vpop.f32.mrb[104].mxu1 }
 0x235   : > { %v3594_v60 = vadd.f32 %v3591_v31, %v6145_v45  ;;  %v3593_v61 = vadd.f32 %v3585_v59, %v3466_v6  ;;  %v3549_v62 = vpop.f32.mrb[107].mxu0  ;;  %v5213_v63 = vpop.f32.mrb[105].mxu1 }
 0x236   : > { %v3595_v30 = vadd.f32 %v3592_v57, %v6145_v45  ;;  %v3588_v0 = vpop.f32.mrb[106].mxu1 }
 0x237   : > { %4928 = vst [vmem:[%s6152_s9 + $0x30] sm:$0xff] %v3594_v60  ;;  %v3596_v1 = vadd.f32 %v3593_v61, %v6145_v45  ;;  %v5214_v2 = vpop.f32.mrb[107].mxu1 }
 0x238   : > { %4929 = vst [vmem:[%s6152_s9 + $0x38] sm:$0xff] %v3595_v30 }
 0x239   : > { %4930 = vst [vmem:[%s6152_s9 + $0x40] sm:$0xff] %v3596_v1 }
 0x23a   : > { %v3681_v33 = vpop.f32.mrb[108].mxu0 }
 0x23b   : > { %v3683_v3 = vpop.f32.mrb[109].mxu0 }
 0x23c   : > { %v3685_v4 = vpop.f32.mrb[110].mxu0  ;;  %v3722_v8 = vpop.f32.mrb[108].mxu1 }
 0x23d   : > { %v3686_v9 = vpop.f32.mrb[111].mxu0  ;;  %v5219_v10 = vpop.f32.mrb[109].mxu1 }
 0x23e   : > { %v3725_v11 = vpop.f32.mrb[110].mxu1 }
 0x23f   : > { %v5220_v12 = vpop.f32.mrb[111].mxu1 }
 0x242   : > { %v3791_v13 = vpop.f32.mrb[112].mxu0 }
 0x243   : > { %v3792_v14 = vadd.f32 %v3791_v13, %v3681_v33  ;;  %v3793_v15 = vpop.f32.mrb[113].mxu0 }
 0x244   : > { %v3794_v16 = vadd.f32 %v3793_v15, %v3683_v3  ;;  %v3795_v17 = vpop.f32.mrb[114].mxu0  ;;  %v3832_v18 = vpop.f32.mrb[112].mxu1 }
 0x245   : > { %v3833_v19 = vadd.f32 %v3832_v18, %v3722_v8  ;;  %v3796_v20 = vpop.f32.mrb[115].mxu0  ;;  %v5225_v21 = vpop.f32.mrb[113].mxu1 }
 0x246   : > { %v3835_v22 = vpop.f32.mrb[114].mxu1 }
 0x247   : > { %v5226_v23 = vpop.f32.mrb[115].mxu1 }
 0x24a   : > { %v3915_v41 = vpop.f32.mrb[116].mxu0 }
 0x24b   : > { %v3962_v24 = vadd.f32 %v3915_v41, %v3792_v14  ;;  %v3917_v25 = vpop.f32.mrb[117].mxu0 }
 0x24c   : > { %v3963_v7 = vadd.f32 %v3917_v25, %v3794_v16  ;;  %v3919_v50 = vpop.f32.mrb[118].mxu0  ;;  %v3956_v27 = vpop.f32.mrb[116].mxu1 }
 0x24d   : > { %v3964_v28 = vadd.f32 %v3956_v27, %v3833_v19  ;;  %v3920_v29 = vpop.f32.mrb[119].mxu0  ;;  %v5231_v53 = vpop.f32.mrb[117].mxu1 }
 0x24e   : > { %v3959_v32 = vpop.f32.mrb[118].mxu1 }
 0x24f   : > { %v5232_v55 = vpop.f32.mrb[119].mxu1 }
 0x252   : > { %v4042_v34 = vpop.f32.mrb[120].mxu0 }
 0x253   : > { %v4089_v35 = vadd.f32 %v4042_v34, %v3962_v24  ;;  %v4044_v36 = vpop.f32.mrb[121].mxu0 }
 0x254   : > { %v4090_v37 = vadd.f32 %v4044_v36, %v3963_v7  ;;  %v4046_v38 = vpop.f32.mrb[122].mxu0  ;;  %v4083_v39 = vpop.f32.mrb[120].mxu1 }
 0x255   : > { %v4091_v40 = vadd.f32 %v4083_v39, %v3964_v28  ;;  %v4047_v42 = vpop.f32.mrb[123].mxu0  ;;  %v5237_v43 = vpop.f32.mrb[121].mxu1 }
 0x256   : > { %v4086_v44 = vpop.f32.mrb[122].mxu1 }
 0x257   : > { %v5238_v46 = vpop.f32.mrb[123].mxu1 }
 0x25a   : > { %v4169_v47 = vpop.f32.mrb[124].mxu0 }
 0x25b   : > { %v4216_v26 = vadd.f32 %v4169_v47, %v4089_v35  ;;  %v4171_v48 = vpop.f32.mrb[125].mxu0 }
 0x25c   : > { %v4217_v6 = vadd.f32 %v4171_v48, %v4090_v37  ;;  %v4173_v49 = vpop.f32.mrb[126].mxu0  ;;  %v4210_v51 = vpop.f32.mrb[124].mxu1 }
 0x25d   : > { %v4218_v52 = vadd.f32 %v4210_v51, %v4091_v40  ;;  %v4174_v5 = vpop.f32.mrb[127].mxu0  ;;  %v5243_v54 = vpop.f32.mrb[125].mxu1 }
 0x25e   : > { %v4213_v31 = vpop.f32.mrb[126].mxu1 }
 0x25f   : > { %v5244_v56 = vpop.f32.mrb[127].mxu1 }
 0x262   : > { %v4296_v57 = vpop.f32.mrb[128].mxu0 }
 0x263   : > { %v4343_v58 = vadd.f32 %v4296_v57, %v4216_v26  ;;  %v4298_v59 = vpop.f32.mrb[129].mxu0 }
 0x264   : > { %v4344_v60 = vadd.f32 %v4298_v59, %v4217_v6  ;;  %v4300_v61 = vpop.f32.mrb[130].mxu0  ;;  %v4337_v62 = vpop.f32.mrb[128].mxu1 }
 0x265   : > { %v4345_v63 = vadd.f32 %v4337_v62, %v4218_v52  ;;  %v4301_v30 = vpop.f32.mrb[131].mxu0  ;;  %v5249_v0 = vpop.f32.mrb[129].mxu1 }
 0x266   : > { %v4340_v1 = vpop.f32.mrb[130].mxu1 }
 0x267   : > { %v5250_v2 = vpop.f32.mrb[131].mxu1 }
 0x26a   : > { %v4423_v33 = vpop.f32.mrb[132].mxu0 }
 0x26b   : > { %v4470_v3 = vadd.f32 %v4423_v33, %v4343_v58  ;;  %v4425_v4 = vpop.f32.mrb[133].mxu0 }
 0x26c   : > { %v4471_v8 = vadd.f32 %v4425_v4, %v4344_v60  ;;  %v4427_v9 = vpop.f32.mrb[134].mxu0  ;;  %v4464_v10 = vpop.f32.mrb[132].mxu1 }
 0x26d   : > { %v4472_v11 = vadd.f32 %v4464_v10, %v4345_v63  ;;  %v4428_v12 = vpop.f32.mrb[135].mxu0  ;;  %v5255_v13 = vpop.f32.mrb[133].mxu1 }
 0x26e   : > { %v4467_v14 = vpop.f32.mrb[134].mxu1 }
 0x26f   : > { %v5256_v15 = vpop.f32.mrb[135].mxu1 }
 0x272   : > { %v4550_v16 = vpop.f32.mrb[136].mxu0 }
 0x273   : > { %v4597_v17 = vadd.f32 %v4550_v16, %v4470_v3  ;;  %v4552_v18 = vpop.f32.mrb[137].mxu0 }
 0x274   : > { %v4598_v19 = vadd.f32 %v4552_v18, %v4471_v8  ;;  %v4554_v20 = vpop.f32.mrb[138].mxu0  ;;  %v4591_v21 = vpop.f32.mrb[136].mxu1 }
 0x275   : > { %v4599_v22 = vadd.f32 %v4591_v21, %v4472_v11  ;;  %v4555_v23 = vpop.f32.mrb[139].mxu0  ;;  %v5261_v41 = vpop.f32.mrb[137].mxu1 }
 0x276   : > { %v4594_v24 = vpop.f32.mrb[138].mxu1 }
 0x277   : > { %v5262_v25 = vpop.f32.mrb[139].mxu1 }
 0x27a   : > { %v4677_v7 = vpop.f32.mrb[140].mxu0 }
 0x27b   : > { %v4724_v50 = vadd.f32 %v4677_v7, %v4597_v17  ;;  %v4679_v27 = vpop.f32.mrb[141].mxu0 }
 0x27c   : > { %v4725_v28 = vadd.f32 %v4679_v27, %v4598_v19  ;;  %v4681_v29 = vpop.f32.mrb[142].mxu0  ;;  %v4718_v53 = vpop.f32.mrb[140].mxu1 }
 0x27d   : > { %v4727_v32 = vadd.f32 %v4724_v50, %v6145_v45  ;;  %v4726_v55 = vadd.f32 %v4718_v53, %v4599_v22  ;;  %v4682_v34 = vpop.f32.mrb[143].mxu0  ;;  %v5267_v35 = vpop.f32.mrb[141].mxu1 }
 0x27e   : > { %v4728_v36 = vadd.f32 %v4725_v28, %v6145_v45  ;;  %v4721_v37 = vpop.f32.mrb[142].mxu1 }
 0x27f   : > { %4975 = vst [vmem:[%s6152_s9 + $0x48] sm:$0xff] %v4727_v32  ;;  %v4729_v38 = vadd.f32 %v4726_v55, %v6145_v45  ;;  %v5268_v39 = vpop.f32.mrb[143].mxu1 }
 0x280   : > { %4976 = vst [vmem:[%s6152_s9 + $0x50] sm:$0xff] %v4728_v36 }
 0x281   : > { %4977 = vst [vmem:[%s6152_s9 + $0x58] sm:$0xff] %v4729_v38 }
 0x282 PF: > { %s13_s12 = sadd.s32 1, %s5305_s12  }
 0x283   : > { %p10_p4 = scmp.ge.s32.totalorder %s13_s12, 4  }
 0x285   :  { %12 = sbr.rel (!%p10_p4) target bundleno = 1 (0x1), region = 76 }

</bundles_post_ra>
